<compile_context>
chip_gen: v7x
topology: tpu7x:2x2x1
jax: 0.10.0
libtpu: 0.0.40
codegen_flags: <defaults>
</compile_context>

<pallas_src>
import functools

import jax
import jax.numpy as jnp
from jax.experimental import pallas as pl
from jax.experimental.pallas import tpu as pltpu


def _round_up(x, m):
    return (x + m - 1) // m * m


# ----------------------------------------------------------------------------
# Pallas kernels
# ----------------------------------------------------------------------------
def _matmul_bias_relu_kernel(a_ref, w_ref, b_ref, o_ref, *, relu):
    # Single full-K block per (i, j): no K grid axis, no accumulator scratch.
    r = jnp.dot(a_ref[...], w_ref[...], preferred_element_type=jnp.float32)
    r = r + b_ref[...]
    if relu:
        r = jnp.maximum(r, 0.0)
    o_ref[...] = r.astype(o_ref.dtype)


def _conv_taps_kernel(*refs, kh, kw):
    # refs = kh shifted-row input refs, weight ref, bias ref, output ref.
    # Each grid step computes one full output row (n, ho, :, :) by accumulating
    # all kh*kw taps on the MXU (bf16 operands, fp32 accumulator).
    x_refs = refs[:kh]
    w_ref, b_ref, o_ref = refs[kh], refs[kh + 1], refs[kh + 2]
    wo = o_ref.shape[2]
    cout = o_ref.shape[3]
    acc = jnp.zeros((wo, cout), jnp.float32)
    for di in range(kh):
        for dj in range(kw):
            tap = x_refs[di][0, 0, dj:dj + wo, :].astype(jnp.bfloat16)
            acc = acc + jnp.dot(tap, w_ref[di * kw + dj],
                                preferred_element_type=jnp.float32)
    r = jnp.maximum(acc + b_ref[...], 0.0)
    o_ref[0, 0] = r.astype(o_ref.dtype)


def _maxpool3x3_kernel(r0_ref, r1_ref, r2_ref, o_ref):
    # 3x3 stride-1 max over shifted row windows; no HBM stacking.
    wo = o_ref.shape[2]
    rows = (r0_ref, r1_ref, r2_ref)
    out = None
    for di in range(3):
        for dj in range(3):
            v = rows[di][0, 0, dj:dj + wo, :]
            out = v if out is None else jnp.maximum(out, v)
    o_ref[0, 0] = out


# ----------------------------------------------------------------------------
# Pallas wrappers
# ----------------------------------------------------------------------------
def matmul_bias_relu(a, w, b, *, relu=True):
    """(M,K) x (K,N) + b [+ ReLU]; bf16 operands, fp32 accumulate, full-K blocks."""
    M, K = a.shape
    _, Nc = w.shape
    tm = min(256, _round_up(M, 8))          # adaptive M tile, >=2 tiles for big M
    Mp = _round_up(M, tm)
    Np = _round_up(Nc, 128)
    tn = Np if Np <= 256 else (256 if Np % 256 == 0 else 128)

    a_p = jnp.pad(a.astype(jnp.bfloat16), ((0, Mp - M), (0, 0)))
    w_p = jnp.pad(w.astype(jnp.bfloat16), ((0, 0), (0, Np - Nc)))
    b_p = jnp.pad(b.astype(jnp.float32), (0, Np - Nc)).reshape(1, Np)

    cost = pl.CostEstimate(
        flops=2 * Mp * K * Np, transcendentals=0,
        bytes_accessed=Mp * K * 2 + K * Np * 2 + Np * 4 + Mp * Np * 4)

    out = pl.pallas_call(
        functools.partial(_matmul_bias_relu_kernel, relu=relu),
        out_shape=jax.ShapeDtypeStruct((Mp, Np), jnp.float32),
        grid=(Mp // tm, Np // tn),
        in_specs=[
            pl.BlockSpec((tm, K), lambda i, j: (i, 0)),
            pl.BlockSpec((K, tn), lambda i, j: (0, j)),
            pl.BlockSpec((1, tn), lambda i, j: (0, j)),
        ],
        out_specs=pl.BlockSpec((tm, tn), lambda i, j: (i, j)),
        compiler_params=pltpu.CompilerParams(
            dimension_semantics=("parallel", "parallel")),
        cost_estimate=cost,
    )(a_p, w_p, b_p)
    return out[:M, :Nc]


def _shifted_row_map(di):
    def imap(n, h):
        return (n, h + di, 0, 0)
    return imap


def conv2d_relu_fused(x, w, b, *, padding):
    """Stride-1 KxK conv + bias + ReLU fused in one pallas_call (no im2col)."""
    N, H, W, C = x.shape
    kh, kw, _, cout = w.shape
    if padding > 0:
        x = jnp.pad(x, ((0, 0), (padding, padding), (padding, padding), (0, 0)))
    Hp, Wp = H + 2 * padding, W + 2 * padding
    Ho, Wo = Hp - kh + 1, Wp - kw + 1

    w_r = w.reshape(kh * kw, C, cout).astype(jnp.bfloat16)
    b_r = b.astype(jnp.float32).reshape(1, cout)

    in_specs = [pl.BlockSpec((1, 1, Wp, C), _shifted_row_map(di)) for di in range(kh)]
    in_specs += [
        pl.BlockSpec((kh * kw, C, cout), lambda n, h: (0, 0, 0)),
        pl.BlockSpec((1, cout), lambda n, h: (0, 0)),
    ]
    cost = pl.CostEstimate(
        flops=2 * N * Ho * Wo * kh * kw * C * cout, transcendentals=0,
        bytes_accessed=(N * Ho * kh * Wp * C * 4 + kh * kw * C * cout * 2
                        + N * Ho * Wo * cout * 4))

    out = pl.pallas_call(
        functools.partial(_conv_taps_kernel, kh=kh, kw=kw),
        out_shape=jax.ShapeDtypeStruct((N, Ho, Wo, cout), jnp.float32),
        grid=(N, Ho),
        in_specs=in_specs,
        out_specs=pl.BlockSpec((1, 1, Wo, cout), lambda n, h: (n, h, 0, 0)),
        compiler_params=pltpu.CompilerParams(
            dimension_semantics=("parallel", "parallel")),
        cost_estimate=cost,
    )(*([x] * kh), w_r, b_r)
    return out


def maxpool3x3_s1(x):
    """MaxPool2d(kernel=3, stride=1, padding=0) on NHWC (fused, no stacking)."""
    N, H, W, C = x.shape
    Ho, Wo = H - 2, W - 2
    in_specs = [pl.BlockSpec((1, 1, W, C), _shifted_row_map(di)) for di in range(3)]
    return pl.pallas_call(
        _maxpool3x3_kernel,
        out_shape=jax.ShapeDtypeStruct((N, Ho, Wo, C), x.dtype),
        grid=(N, Ho),
        in_specs=in_specs,
        out_specs=pl.BlockSpec((1, 1, Wo, C), lambda n, h: (n, h, 0, 0)),
        compiler_params=pltpu.CompilerParams(
            dimension_semantics=("parallel", "parallel")),
    )(x, x, x)


# ----------------------------------------------------------------------------
# Parameters (deterministic He-style init) and Inception forward
# ----------------------------------------------------------------------------
def init_conv(key, kh, kw, cin, cout):
    std = (2.0 / (kh * kw * cin)) ** 0.5
    w = jax.random.normal(key, (kh, kw, cin, cout), jnp.float32) * std
    b = jnp.zeros((cout,), jnp.float32)
    return {"w": w, "b": b}


def init_inception(key, in_channels, out1, redu3, out3, redu5, out5, pool_out):
    ks = jax.random.split(key, 6)
    return {
        "b1": init_conv(ks[0], 1, 1, in_channels, out1),
        "b2_1": init_conv(ks[1], 1, 1, in_channels, redu3),
        "b2_2": init_conv(ks[2], 3, 3, redu3, out3),
        "b3_1": init_conv(ks[3], 1, 1, in_channels, redu5),
        "b3_2": init_conv(ks[4], 5, 5, redu5, out5),
        "b4": init_conv(ks[5], 1, 1, in_channels, pool_out),
    }


def inception_forward(p, x):
    # x: (N, H, W, Cin) NHWC float32
    N, H, W, Cin = x.shape
    out1 = p["b1"]["w"].shape[-1]
    redu3 = p["b2_1"]["w"].shape[-1]
    redu5 = p["b3_1"]["w"].shape[-1]
    pool_out = p["b4"]["w"].shape[-1]

    # Fuse the three 1x1 convs that share input x into one matmul.
    w_cat = jnp.concatenate([p["b1"]["w"].reshape(Cin, out1),
                             p["b2_1"]["w"].reshape(Cin, redu3),
                             p["b3_1"]["w"].reshape(Cin, redu5)], axis=1)
    b_cat = jnp.concatenate([p["b1"]["b"], p["b2_1"]["b"], p["b3_1"]["b"]])
    y = matmul_bias_relu(x.reshape(N * H * W, Cin), w_cat, b_cat)
    o1 = y[:, :out1].reshape(N, H, W, out1)
    r3 = y[:, out1:out1 + redu3].reshape(N, H, W, redu3)
    r5 = y[:, out1 + redu3:out1 + redu3 + redu5].reshape(N, H, W, redu5)

    # Branch 2: 3x3 conv, pad 1. Branch 3: 5x5 conv, pad 2.
    o2 = conv2d_relu_fused(r3, p["b2_2"]["w"], p["b2_2"]["b"], padding=1)
    o3 = conv2d_relu_fused(r5, p["b3_2"]["w"], p["b3_2"]["b"], padding=2)

    # Branch 4: MaxPool2d(3, stride=1, no pad) then 1x1 conv with padding=1
    # (zero-pad then project, exactly like the PyTorch reference).
    pool = maxpool3x3_s1(x)
    pool = jnp.pad(pool, ((0, 0), (1, 1), (1, 1), (0, 0)))
    o4 = matmul_bias_relu(pool.reshape(N * H * W, Cin),
                          p["b4"]["w"].reshape(Cin, pool_out),
                          p["b4"]["b"]).reshape(N, H, W, pool_out)

    # torch.cat along channel dim (dim=1 in NCHW) == concat along -1 in NHWC.
    return jnp.concatenate([o1, o2, o3, o4], axis=-1)


if __name__ == "__main__":
    key = jax.random.PRNGKey(0)
    pkey, xkey = jax.random.split(key)
    cfg = dict(in_channels=4, out1=16, redu3=8, out3=16, redu5=4, out5=8,
               pool_out=8)
    params = init_inception(pkey, **cfg)

    # PyTorch-equivalent input: NCHW (2, 4, 16, 16); we feed the NHWC transpose.
    x = jax.random.normal(xkey, (2, 16, 16, cfg["in_channels"]), jnp.float32)

    fwd = jax.jit(inception_forward)
    out = jax.block_until_ready(fwd(params, x))

    expect_c = cfg["out1"] + cfg["out3"] + cfg["out5"] + cfg["pool_out"]
    assert out.shape == (2, 16, 16, expect_c)
    assert bool(jnp.all(jnp.isfinite(out)))
    print("KERNEL_OK")
</pallas_src>

<mosaic_0001>
module attributes {stable_mosaic.version = 11 : i64} {
  func.func @_matmul_bias_relu_kernel(%arg0: i32, %arg1: i32, %arg2: memref<256x4xbf16, #tpu.memory_space<vmem>>, %arg3: memref<4x128xbf16, #tpu.memory_space<vmem>>, %arg4: memref<1x128xf32, #tpu.memory_space<vmem>>, %arg5: memref<256x128xf32, #tpu.memory_space<vmem>>) attributes {dimension_semantics = [#tpu.dimension_semantics<parallel>, #tpu.dimension_semantics<parallel>], iteration_bounds = array<i64: 2, 1>, scalar_prefetch = 0 : i64, scratch_operands = 0 : i64, tpu.core_type = #tpu.core_type<tc>, window_params = [{transform_indices = @transform_0, window_bounds = array<i64: 256, 4>}, {transform_indices = @transform_1, window_bounds = array<i64: 4, 128>}, {transform_indices = @transform_2, window_bounds = array<i64: 1, 128>}, {transform_indices = @transform_3, window_bounds = array<i64: 256, 128>}]} {
    %c0 = arith.constant 0 : index
    %c0_0 = arith.constant 0 : index
    %0 = vector.load %arg2[%c0, %c0_0] : memref<256x4xbf16, #tpu.memory_space<vmem>>, vector<256x4xbf16>
    %c0_1 = arith.constant 0 : index
    %c0_2 = arith.constant 0 : index
    %1 = vector.load %arg3[%c0_1, %c0_2] : memref<4x128xbf16, #tpu.memory_space<vmem>>, vector<4x128xbf16>
    %cst = arith.constant dense<0.000000e+00> : vector<256x128xf32>
    %2 = tpu.matmul %0, %1, %cst {dimension_numbers = #tpu.dot_dimension_numbers<[1], [0], [0], [1], [0, 0, 1, 1], [], []>} : vector<256x4xbf16>, vector<4x128xbf16>, vector<256x128xf32> -> vector<256x128xf32>
    %c0_3 = arith.constant 0 : index
    %c0_4 = arith.constant 0 : index
    %3 = vector.load %arg4[%c0_3, %c0_4] : memref<1x128xf32, #tpu.memory_space<vmem>>, vector<1x128xf32>
    %4 = vector.broadcast %3 : vector<1x128xf32> to vector<256x128xf32>
    %5 = arith.addf %2, %4 : vector<256x128xf32>
    %cst_5 = arith.constant 0.000000e+00 : f32
    %6 = vector.broadcast %cst_5 : f32 to vector<256x128xf32>
    %7 = arith.maximumf %5, %6 : vector<256x128xf32>
    %c0_6 = arith.constant 0 : index
    %c0_7 = arith.constant 0 : index
    %8 = vector.load %arg5[%c0_6, %c0_7] : memref<256x128xf32, #tpu.memory_space<vmem>>, vector<256x128xf32>
    tpu.vector_store %arg5[%c0_6, %c0_7], %7 {strides = array<i32>} : memref<256x128xf32, #tpu.memory_space<vmem>>, vector<256x128xf32>,
    return
  }
  func.func @transform_0(%arg0: i32, %arg1: i32) -> (i32, i32) {
    %c0_i32 = arith.constant 0 : i32
    %c0_i32_0 = arith.constant 0 : i32
    return %arg0, %c0_i32 : i32, i32
  }
  func.func @transform_1(%arg0: i32, %arg1: i32) -> (i32, i32) {
    %c0_i32 = arith.constant 0 : i32
    %c0_i32_0 = arith.constant 0 : i32
    return %c0_i32, %arg1 : i32, i32
  }
  func.func @transform_2(%arg0: i32, %arg1: i32) -> (i32, i32) {
    %c0_i32 = arith.constant 0 : i32
    %c0_i32_0 = arith.constant 0 : i32
    return %c0_i32, %arg1 : i32, i32
  }
  func.func @transform_3(%arg0: i32, %arg1: i32) -> (i32, i32) {
    %c0_i32 = arith.constant 0 : i32
    return %arg0, %arg1 : i32, i32
  }
}

module attributes {stable_mosaic.version = 11 : i64} {
  func.func @_conv_taps_kernel(%arg0: i32, %arg1: i32, %arg2: memref<1x1x18x8xf32, #tpu.memory_space<vmem>>, %arg3: memref<1x1x18x8xf32, #tpu.memory_space<vmem>>, %arg4: memref<1x1x18x8xf32, #tpu.memory_space<vmem>>, %arg5: memref<9x8x16xbf16, #tpu.memory_space<vmem>>, %arg6: memref<1x16xf32, #tpu.memory_space<vmem>>, %arg7: memref<1x1x16x16xf32, #tpu.memory_space<vmem>>) attributes {dimension_semantics = [#tpu.dimension_semantics<parallel>, #tpu.dimension_semantics<parallel>], iteration_bounds = array<i64: 2, 16>, scalar_prefetch = 0 : i64, scratch_operands = 0 : i64, tpu.core_type = #tpu.core_type<tc>, window_params = [{transform_indices = @transform_0, window_bounds = array<i64: 1, 1, 18, 8>}, {transform_indices = @transform_1, window_bounds = array<i64: 1, 1, 18, 8>}, {transform_indices = @transform_2, window_bounds = array<i64: 1, 1, 18, 8>}, {pipeline_mode = #tpu.pipeline_mode<synchronous>, transform_indices = @transform_3, window_bounds = array<i64: 9, 8, 16>}, {pipeline_mode = #tpu.pipeline_mode<synchronous>, transform_indices = @transform_4, window_bounds = array<i64: 1, 16>}, {transform_indices = @transform_5, window_bounds = array<i64: 1, 1, 16, 16>}]} {
    %cst = arith.constant 0.000000e+00 : f32
    %0 = vector.broadcast %cst : f32 to vector<16x16xf32>
    %c0 = arith.constant 0 : index
    %c0_0 = arith.constant 0 : index
    %c0_1 = arith.constant 0 : index
    %c0_2 = arith.constant 0 : index
    %1 = vector.load %arg2[%c0, %c0_0, %c0_1, %c0_2] : memref<1x1x18x8xf32, #tpu.memory_space<vmem>>, vector<1x1x16x8xf32>
    %2 = vector.shape_cast %1 : vector<1x1x16x8xf32> to vector<16x8xf32>
    %3 = arith.truncf %2 : vector<16x8xf32> to vector<16x8xbf16>
    %c0_3 = arith.constant 0 : index
    %c0_4 = arith.constant 0 : index
    %c0_5 = arith.constant 0 : index
    %4 = vector.load %arg5[%c0_3, %c0_4, %c0_5] : memref<9x8x16xbf16, #tpu.memory_space<vmem>>, vector<1x8x16xbf16>
    %5 = vector.shape_cast %4 : vector<1x8x16xbf16> to vector<8x16xbf16>
    %cst_6 = arith.constant dense<0.000000e+00> : vector<16x16xf32>
    %6 = tpu.matmul %3, %5, %cst_6 {dimension_numbers = #tpu.dot_dimension_numbers<[1], [0], [0], [1], [0, 0, 1, 1], [], []>} : vector<16x8xbf16>, vector<8x16xbf16>, vector<16x16xf32> -> vector<16x16xf32>
    %7 = arith.addf %0, %6 : vector<16x16xf32>
    %c0_7 = arith.constant 0 : index
    %c0_8 = arith.constant 0 : index
    %c1 = arith.constant 1 : index
    %c0_9 = arith.constant 0 : index
    %8 = vector.load %arg2[%c0_7, %c0_8, %c1, %c0_9] : memref<1x1x18x8xf32, #tpu.memory_space<vmem>>, vector<1x1x16x8xf32>
    %9 = vector.shape_cast %8 : vector<1x1x16x8xf32> to vector<16x8xf32>
    %10 = arith.truncf %9 : vector<16x8xf32> to vector<16x8xbf16>
    %c1_10 = arith.constant 1 : index
    %c0_11 = arith.constant 0 : index
    %c0_12 = arith.constant 0 : index
    %11 = vector.load %arg5[%c1_10, %c0_11, %c0_12] : memref<9x8x16xbf16, #tpu.memory_space<vmem>>, vector<1x8x16xbf16>
    %12 = vector.shape_cast %11 : vector<1x8x16xbf16> to vector<8x16xbf16>
    %cst_13 = arith.constant dense<0.000000e+00> : vector<16x16xf32>
    %13 = tpu.matmul %10, %12, %cst_13 {dimension_numbers = #tpu.dot_dimension_numbers<[1], [0], [0], [1], [0, 0, 1, 1], [], []>} : vector<16x8xbf16>, vector<8x16xbf16>, vector<16x16xf32> -> vector<16x16xf32>
    %14 = arith.addf %7, %13 : vector<16x16xf32>
    %c0_14 = arith.constant 0 : index
    %c0_15 = arith.constant 0 : index
    %c2 = arith.constant 2 : index
    %c0_16 = arith.constant 0 : index
    %15 = vector.load %arg2[%c0_14, %c0_15, %c2, %c0_16] : memref<1x1x18x8xf32, #tpu.memory_space<vmem>>, vector<1x1x16x8xf32>
    %16 = vector.shape_cast %15 : vector<1x1x16x8xf32> to vector<16x8xf32>
    %17 = arith.truncf %16 : vector<16x8xf32> to vector<16x8xbf16>
    %c2_17 = arith.constant 2 : index
    %c0_18 = arith.constant 0 : index
    %c0_19 = arith.constant 0 : index
    %18 = vector.load %arg5[%c2_17, %c0_18, %c0_19] : memref<9x8x16xbf16, #tpu.memory_space<vmem>>, vector<1x8x16xbf16>
    %19 = vector.shape_cast %18 : vector<1x8x16xbf16> to vector<8x16xbf16>
    %cst_20 = arith.constant dense<0.000000e+00> : vector<16x16xf32>
    %20 = tpu.matmul %17, %19, %cst_20 {dimension_numbers = #tpu.dot_dimension_numbers<[1], [0], [0], [1], [0, 0, 1, 1], [], []>} : vector<16x8xbf16>, vector<8x16xbf16>, vector<16x16xf32> -> vector<16x16xf32>
    %21 = arith.addf %14, %20 : vector<16x16xf32>
    %c0_21 = arith.constant 0 : index
    %c0_22 = arith.constant 0 : index
    %c0_23 = arith.constant 0 : index
    %c0_24 = arith.constant 0 : index
    %22 = vector.load %arg3[%c0_21, %c0_22, %c0_23, %c0_24] : memref<1x1x18x8xf32, #tpu.memory_space<vmem>>, vector<1x1x16x8xf32>
    %23 = vector.shape_cast %22 : vector<1x1x16x8xf32> to vector<16x8xf32>
    %24 = arith.truncf %23 : vector<16x8xf32> to vector<16x8xbf16>
    %c3 = arith.constant 3 : index
    %c0_25 = arith.constant 0 : index
    %c0_26 = arith.constant 0 : index
    %25 = vector.load %arg5[%c3, %c0_25, %c0_26] : memref<9x8x16xbf16, #tpu.memory_space<vmem>>, vector<1x8x16xbf16>
    %26 = vector.shape_cast %25 : vector<1x8x16xbf16> to vector<8x16xbf16>
    %cst_27 = arith.constant dense<0.000000e+00> : vector<16x16xf32>
    %27 = tpu.matmul %24, %26, %cst_27 {dimension_numbers = #tpu.dot_dimension_numbers<[1], [0], [0], [1], [0, 0, 1, 1], [], []>} : vector<16x8xbf16>, vector<8x16xbf16>, vector<16x16xf32> -> vector<16x16xf32>
    %28 = arith.addf %21, %27 : vector<16x16xf32>
    %c0_28 = arith.constant 0 : index
    %c0_29 = arith.constant 0 : index
    %c1_30 = arith.constant 1 : index
    %c0_31 = arith.constant 0 : index
    %29 = vector.load %arg3[%c0_28, %c0_29, %c1_30, %c0_31] : memref<1x1x18x8xf32, #tpu.memory_space<vmem>>, vector<1x1x16x8xf32>
    %30 = vector.shape_cast %29 : vector<1x1x16x8xf32> to vector<16x8xf32>
    %31 = arith.truncf %30 : vector<16x8xf32> to vector<16x8xbf16>
    %c4 = arith.constant 4 : index
    %c0_32 = arith.constant 0 : index
    %c0_33 = arith.constant 0 : index
    %32 = vector.load %arg5[%c4, %c0_32, %c0_33] : memref<9x8x16xbf16, #tpu.memory_space<vmem>>, vector<1x8x16xbf16>
    %33 = vector.shape_cast %32 : vector<1x8x16xbf16> to vector<8x16xbf16>
    %cst_34 = arith.constant dense<0.000000e+00> : vector<16x16xf32>
    %34 = tpu.matmul %31, %33, %cst_34 {dimension_numbers = #tpu.dot_dimension_numbers<[1], [0], [0], [1], [0, 0, 1, 1], [], []>} : vector<16x8xbf16>, vector<8x16xbf16>, vector<16x16xf32> -> vector<16x16xf32>
    %35 = arith.addf %28, %34 : vector<16x16xf32>
    %c0_35 = arith.constant 0 : index
    %c0_36 = arith.constant 0 : index
    %c2_37 = arith.constant 2 : index
    %c0_38 = arith.constant 0 : index
    %36 = vector.load %arg3[%c0_35, %c0_36, %c2_37, %c0_38] : memref<1x1x18x8xf32, #tpu.memory_space<vmem>>, vector<1x1x16x8xf32>
    %37 = vector.shape_cast %36 : vector<1x1x16x8xf32> to vector<16x8xf32>
    %38 = arith.truncf %37 : vector<16x8xf32> to vector<16x8xbf16>
    %c5 = arith.constant 5 : index
    %c0_39 = arith.constant 0 : index
    %c0_40 = arith.constant 0 : index
    %39 = vector.load %arg5[%c5, %c0_39, %c0_40] : memref<9x8x16xbf16, #tpu.memory_space<vmem>>, vector<1x8x16xbf16>
    %40 = vector.shape_cast %39 : vector<1x8x16xbf16> to vector<8x16xbf16>
    %cst_41 = arith.constant dense<0.000000e+00> : vector<16x16xf32>
    %41 = tpu.matmul %38, %40, %cst_41 {dimension_numbers = #tpu.dot_dimension_numbers<[1], [0], [0], [1], [0, 0, 1, 1], [], []>} : vector<16x8xbf16>, vector<8x16xbf16>, vector<16x16xf32> -> vector<16x16xf32>
    %42 = arith.addf %35, %41 : vector<16x16xf32>
    %c0_42 = arith.constant 0 : index
    %c0_43 = arith.constant 0 : index
    %c0_44 = arith.constant 0 : index
    %c0_45 = arith.constant 0 : index
    %43 = vector.load %arg4[%c0_42, %c0_43, %c0_44, %c0_45] : memref<1x1x18x8xf32, #tpu.memory_space<vmem>>, vector<1x1x16x8xf32>
    %44 = vector.shape_cast %43 : vector<1x1x16x8xf32> to vector<16x8xf32>
    %45 = arith.truncf %44 : vector<16x8xf32> to vector<16x8xbf16>
    %c6 = arith.constant 6 : index
    %c0_46 = arith.constant 0 : index
    %c0_47 = arith.constant 0 : index
    %46 = vector.load %arg5[%c6, %c0_46, %c0_47] : memref<9x8x16xbf16, #tpu.memory_space<vmem>>, vector<1x8x16xbf16>
    %47 = vector.shape_cast %46 : vector<1x8x16xbf16> to vector<8x16xbf16>
    %cst_48 = arith.constant dense<0.000000e+00> : vector<16x16xf32>
    %48 = tpu.matmul %45, %47, %cst_48 {dimension_numbers = #tpu.dot_dimension_numbers<[1], [0], [0], [1], [0, 0, 1, 1], [], []>} : vector<16x8xbf16>, vector<8x16xbf16>, vector<16x16xf32> -> vector<16x16xf32>
    %49 = arith.addf %42, %48 : vector<16x16xf32>
    %c0_49 = arith.constant 0 : index
    %c0_50 = arith.constant 0 : index
    %c1_51 = arith.constant 1 : index
    %c0_52 = arith.constant 0 : index
    %50 = vector.load %arg4[%c0_49, %c0_50, %c1_51, %c0_52] : memref<1x1x18x8xf32, #tpu.memory_space<vmem>>, vector<1x1x16x8xf32>
    %51 = vector.shape_cast %50 : vector<1x1x16x8xf32> to vector<16x8xf32>
    %52 = arith.truncf %51 : vector<16x8xf32> to vector<16x8xbf16>
    %c7 = arith.constant 7 : index
    %c0_53 = arith.constant 0 : index
    %c0_54 = arith.constant 0 : index
    %53 = vector.load %arg5[%c7, %c0_53, %c0_54] : memref<9x8x16xbf16, #tpu.memory_space<vmem>>, vector<1x8x16xbf16>
    %54 = vector.shape_cast %53 : vector<1x8x16xbf16> to vector<8x16xbf16>
    %cst_55 = arith.constant dense<0.000000e+00> : vector<16x16xf32>
    %55 = tpu.matmul %52, %54, %cst_55 {dimension_numbers = #tpu.dot_dimension_numbers<[1], [0], [0], [1], [0, 0, 1, 1], [], []>} : vector<16x8xbf16>, vector<8x16xbf16>, vector<16x16xf32> -> vector<16x16xf32>
    %56 = arith.addf %49, %55 : vector<16x16xf32>
    %c0_56 = arith.constant 0 : index
    %c0_57 = arith.constant 0 : index
    %c2_58 = arith.constant 2 : index
    %c0_59 = arith.constant 0 : index
    %57 = vector.load %arg4[%c0_56, %c0_57, %c2_58, %c0_59] : memref<1x1x18x8xf32, #tpu.memory_space<vmem>>, vector<1x1x16x8xf32>
    %58 = vector.shape_cast %57 : vector<1x1x16x8xf32> to vector<16x8xf32>
    %59 = arith.truncf %58 : vector<16x8xf32> to vector<16x8xbf16>
    %c8 = arith.constant 8 : index
    %c0_60 = arith.constant 0 : index
    %c0_61 = arith.constant 0 : index
    %60 = vector.load %arg5[%c8, %c0_60, %c0_61] : memref<9x8x16xbf16, #tpu.memory_space<vmem>>, vector<1x8x16xbf16>
    %61 = vector.shape_cast %60 : vector<1x8x16xbf16> to vector<8x16xbf16>
    %cst_62 = arith.constant dense<0.000000e+00> : vector<16x16xf32>
    %62 = tpu.matmul %59, %61, %cst_62 {dimension_numbers = #tpu.dot_dimension_numbers<[1], [0], [0], [1], [0, 0, 1, 1], [], []>} : vector<16x8xbf16>, vector<8x16xbf16>, vector<16x16xf32> -> vector<16x16xf32>
    %63 = arith.addf %56, %62 : vector<16x16xf32>
    %c0_63 = arith.constant 0 : index
    %c0_64 = arith.constant 0 : index
    %64 = vector.load %arg6[%c0_63, %c0_64] : memref<1x16xf32, #tpu.memory_space<vmem>>, vector<1x16xf32>
    %65 = vector.broadcast %64 : vector<1x16xf32> to vector<16x16xf32>
    %66 = arith.addf %63, %65 : vector<16x16xf32>
    %cst_65 = arith.constant 0.000000e+00 : f32
    %67 = vector.broadcast %cst_65 : f32 to vector<16x16xf32>
    %68 = arith.maximumf %66, %67 : vector<16x16xf32>
    %c0_66 = arith.constant 0 : index
    %c0_67 = arith.constant 0 : index
    %c0_68 = arith.constant 0 : index
    %c0_69 = arith.constant 0 : index
    %69 = vector.load %arg7[%c0_66, %c0_67, %c0_68, %c0_69] : memref<1x1x16x16xf32, #tpu.memory_space<vmem>>, vector<1x1x16x16xf32>
    %70 = vector.shape_cast %69 : vector<1x1x16x16xf32> to vector<16x16xf32>
    %71 = vector.shape_cast %68 : vector<16x16xf32> to vector<1x1x16x16xf32>
    tpu.vector_store %arg7[%c0_66, %c0_67, %c0_68, %c0_69], %71 {strides = array<i32>} : memref<1x1x16x16xf32, #tpu.memory_space<vmem>>, vector<1x1x16x16xf32>,
    return
  }
  func.func @transform_0(%arg0: i32, %arg1: i32) -> (i32, i32, i32, i32) {
    %c0_i32 = arith.constant 0 : i32
    %0 = arith.addi %arg1, %c0_i32 : i32
    %c0_i32_0 = arith.constant 0 : i32
    %c0_i32_1 = arith.constant 0 : i32
    %c0_i32_2 = arith.constant 0 : i32
    return %arg0, %0, %c0_i32_0, %c0_i32_1 : i32, i32, i32, i32
  }
  func.func @transform_1(%arg0: i32, %arg1: i32) -> (i32, i32, i32, i32) {
    %c1_i32 = arith.constant 1 : i32
    %0 = arith.addi %arg1, %c1_i32 : i32
    %c0_i32 = arith.constant 0 : i32
    %c0_i32_0 = arith.constant 0 : i32
    %c0_i32_1 = arith.constant 0 : i32
    return %arg0, %0, %c0_i32, %c0_i32_0 : i32, i32, i32, i32
  }
  func.func @transform_2(%arg0: i32, %arg1: i32) -> (i32, i32, i32, i32) {
    %c2_i32 = arith.constant 2 : i32
    %0 = arith.addi %arg1, %c2_i32 : i32
    %c0_i32 = arith.constant 0 : i32
    %c0_i32_0 = arith.constant 0 : i32
    %c0_i32_1 = arith.constant 0 : i32
    return %arg0, %0, %c0_i32, %c0_i32_0 : i32, i32, i32, i32
  }
  func.func @transform_3(%arg0: i32, %arg1: i32) -> (i32, i32, i32) {
    %c0_i32 = arith.constant 0 : i32
    %c0_i32_0 = arith.constant 0 : i32
    %c0_i32_1 = arith.constant 0 : i32
    %c0_i32_2 = arith.constant 0 : i32
    return %c0_i32, %c0_i32_0, %c0_i32_1 : i32, i32, i32
  }
  func.func @transform_4(%arg0: i32, %arg1: i32) -> (i32, i32) {
    %c0_i32 = arith.constant 0 : i32
    %c0_i32_0 = arith.constant 0 : i32
    %c0_i32_1 = arith.constant 0 : i32
    return %c0_i32, %c0_i32_0 : i32, i32
  }
  func.func @transform_5(%arg0: i32, %arg1: i32) -> (i32, i32, i32, i32) {
    %c0_i32 = arith.constant 0 : i32
    %c0_i32_0 = arith.constant 0 : i32
    %c0_i32_1 = arith.constant 0 : i32
    return %arg0, %arg1, %c0_i32, %c0_i32_0 : i32, i32, i32, i32
  }
}

module attributes {stable_mosaic.version = 11 : i64} {
  func.func @_conv_taps_kernel(%arg0: i32, %arg1: i32, %arg2: memref<1x1x20x4xf32, #tpu.memory_space<vmem>>, %arg3: memref<1x1x20x4xf32, #tpu.memory_space<vmem>>, %arg4: memref<1x1x20x4xf32, #tpu.memory_space<vmem>>, %arg5: memref<1x1x20x4xf32, #tpu.memory_space<vmem>>, %arg6: memref<1x1x20x4xf32, #tpu.memory_space<vmem>>, %arg7: memref<25x4x8xbf16, #tpu.memory_space<vmem>>, %arg8: memref<1x8xf32, #tpu.memory_space<vmem>>, %arg9: memref<1x1x16x8xf32, #tpu.memory_space<vmem>>) attributes {dimension_semantics = [#tpu.dimension_semantics<parallel>, #tpu.dimension_semantics<parallel>], iteration_bounds = array<i64: 2, 16>, scalar_prefetch = 0 : i64, scratch_operands = 0 : i64, tpu.core_type = #tpu.core_type<tc>, window_params = [{transform_indices = @transform_0, window_bounds = array<i64: 1, 1, 20, 4>}, {transform_indices = @transform_1, window_bounds = array<i64: 1, 1, 20, 4>}, {transform_indices = @transform_2, window_bounds = array<i64: 1, 1, 20, 4>}, {transform_indices = @transform_3, window_bounds = array<i64: 1, 1, 20, 4>}, {transform_indices = @transform_4, window_bounds = array<i64: 1, 1, 20, 4>}, {pipeline_mode = #tpu.pipeline_mode<synchronous>, transform_indices = @transform_5, window_bounds = array<i64: 25, 4, 8>}, {pipeline_mode = #tpu.pipeline_mode<synchronous>, transform_indices = @transform_6, window_bounds = array<i64: 1, 8>}, {transform_indices = @transform_7, window_bounds = array<i64: 1, 1, 16, 8>}]} {
    %cst = arith.constant 0.000000e+00 : f32
    %0 = vector.broadcast %cst : f32 to vector<16x8xf32>
    %c0 = arith.constant 0 : index
    %c0_0 = arith.constant 0 : index
    %c0_1 = arith.constant 0 : index
    %c0_2 = arith.constant 0 : index
    %1 = vector.load %arg2[%c0, %c0_0, %c0_1, %c0_2] : memref<1x1x20x4xf32, #tpu.memory_space<vmem>>, vector<1x1x16x4xf32>
    %2 = vector.shape_cast %1 : vector<1x1x16x4xf32> to vector<16x4xf32>
    %3 = arith.truncf %2 : vector<16x4xf32> to vector<16x4xbf16>
    %c0_3 = arith.constant 0 : index
    %c0_4 = arith.constant 0 : index
    %c0_5 = arith.constant 0 : index
    %4 = vector.load %arg7[%c0_3, %c0_4, %c0_5] : memref<25x4x8xbf16, #tpu.memory_space<vmem>>, vector<1x4x8xbf16>
    %5 = vector.shape_cast %4 : vector<1x4x8xbf16> to vector<4x8xbf16>
    %cst_6 = arith.constant dense<0.000000e+00> : vector<16x8xf32>
    %6 = tpu.matmul %3, %5, %cst_6 {dimension_numbers = #tpu.dot_dimension_numbers<[1], [0], [0], [1], [0, 0, 1, 1], [], []>} : vector<16x4xbf16>, vector<4x8xbf16>, vector<16x8xf32> -> vector<16x8xf32>
    %7 = arith.addf %0, %6 : vector<16x8xf32>
    %c0_7 = arith.constant 0 : index
    %c0_8 = arith.constant 0 : index
    %c1 = arith.constant 1 : index
    %c0_9 = arith.constant 0 : index
    %8 = vector.load %arg2[%c0_7, %c0_8, %c1, %c0_9] : memref<1x1x20x4xf32, #tpu.memory_space<vmem>>, vector<1x1x16x4xf32>
    %9 = vector.shape_cast %8 : vector<1x1x16x4xf32> to vector<16x4xf32>
    %10 = arith.truncf %9 : vector<16x4xf32> to vector<16x4xbf16>
    %c1_10 = arith.constant 1 : index
    %c0_11 = arith.constant 0 : index
    %c0_12 = arith.constant 0 : index
    %11 = vector.load %arg7[%c1_10, %c0_11, %c0_12] : memref<25x4x8xbf16, #tpu.memory_space<vmem>>, vector<1x4x8xbf16>
    %12 = vector.shape_cast %11 : vector<1x4x8xbf16> to vector<4x8xbf16>
    %cst_13 = arith.constant dense<0.000000e+00> : vector<16x8xf32>
    %13 = tpu.matmul %10, %12, %cst_13 {dimension_numbers = #tpu.dot_dimension_numbers<[1], [0], [0], [1], [0, 0, 1, 1], [], []>} : vector<16x4xbf16>, vector<4x8xbf16>, vector<16x8xf32> -> vector<16x8xf32>
    %14 = arith.addf %7, %13 : vector<16x8xf32>
    %c0_14 = arith.constant 0 : index
    %c0_15 = arith.constant 0 : index
    %c2 = arith.constant 2 : index
    %c0_16 = arith.constant 0 : index
    %15 = vector.load %arg2[%c0_14, %c0_15, %c2, %c0_16] : memref<1x1x20x4xf32, #tpu.memory_space<vmem>>, vector<1x1x16x4xf32>
    %16 = vector.shape_cast %15 : vector<1x1x16x4xf32> to vector<16x4xf32>
    %17 = arith.truncf %16 : vector<16x4xf32> to vector<16x4xbf16>
    %c2_17 = arith.constant 2 : index
    %c0_18 = arith.constant 0 : index
    %c0_19 = arith.constant 0 : index
    %18 = vector.load %arg7[%c2_17, %c0_18, %c0_19] : memref<25x4x8xbf16, #tpu.memory_space<vmem>>, vector<1x4x8xbf16>
    %19 = vector.shape_cast %18 : vector<1x4x8xbf16> to vector<4x8xbf16>
    %cst_20 = arith.constant dense<0.000000e+00> : vector<16x8xf32>
    %20 = tpu.matmul %17, %19, %cst_20 {dimension_numbers = #tpu.dot_dimension_numbers<[1], [0], [0], [1], [0, 0, 1, 1], [], []>} : vector<16x4xbf16>, vector<4x8xbf16>, vector<16x8xf32> -> vector<16x8xf32>
    %21 = arith.addf %14, %20 : vector<16x8xf32>
    %c0_21 = arith.constant 0 : index
    %c0_22 = arith.constant 0 : index
    %c3 = arith.constant 3 : index
    %c0_23 = arith.constant 0 : index
    %22 = vector.load %arg2[%c0_21, %c0_22, %c3, %c0_23] : memref<1x1x20x4xf32, #tpu.memory_space<vmem>>, vector<1x1x16x4xf32>
    %23 = vector.shape_cast %22 : vector<1x1x16x4xf32> to vector<16x4xf32>
    %24 = arith.truncf %23 : vector<16x4xf32> to vector<16x4xbf16>
    %c3_24 = arith.constant 3 : index
    %c0_25 = arith.constant 0 : index
    %c0_26 = arith.constant 0 : index
    %25 = vector.load %arg7[%c3_24, %c0_25, %c0_26] : memref<25x4x8xbf16, #tpu.memory_space<vmem>>, vector<1x4x8xbf16>
    %26 = vector.shape_cast %25 : vector<1x4x8xbf16> to vector<4x8xbf16>
    %cst_27 = arith.constant dense<0.000000e+00> : vector<16x8xf32>
    %27 = tpu.matmul %24, %26, %cst_27 {dimension_numbers = #tpu.dot_dimension_numbers<[1], [0], [0], [1], [0, 0, 1, 1], [], []>} : vector<16x4xbf16>, vector<4x8xbf16>, vector<16x8xf32> -> vector<16x8xf32>
    %28 = arith.addf %21, %27 : vector<16x8xf32>
    %c0_28 = arith.constant 0 : index
    %c0_29 = arith.constant 0 : index
    %c4 = arith.constant 4 : index
    %c0_30 = arith.constant 0 : index
    %29 = vector.load %arg2[%c0_28, %c0_29, %c4, %c0_30] : memref<1x1x20x4xf32, #tpu.memory_space<vmem>>, vector<1x1x16x4xf32>
    %30 = vector.shape_cast %29 : vector<1x1x16x4xf32> to vector<16x4xf32>
    %31 = arith.truncf %30 : vector<16x4xf32> to vector<16x4xbf16>
    %c4_31 = arith.constant 4 : index
    %c0_32 = arith.constant 0 : index
    %c0_33 = arith.constant 0 : index
    %32 = vector.load %arg7[%c4_31, %c0_32, %c0_33] : memref<25x4x8xbf16, #tpu.memory_space<vmem>>, vector<1x4x8xbf16>
    %33 = vector.shape_cast %32 : vector<1x4x8xbf16> to vector<4x8xbf16>
    %cst_34 = arith.constant dense<0.000000e+00> : vector<16x8xf32>
    %34 = tpu.matmul %31, %33, %cst_34 {dimension_numbers = #tpu.dot_dimension_numbers<[1], [0], [0], [1], [0, 0, 1, 1], [], []>} : vector<16x4xbf16>, vector<4x8xbf16>, vector<16x8xf32> -> vector<16x8xf32>
    %35 = arith.addf %28, %34 : vector<16x8xf32>
    %c0_35 = arith.constant 0 : index
    %c0_36 = arith.constant 0 : index
    %c0_37 = arith.constant 0 : index
    %c0_38 = arith.constant 0 : index
    %36 = vector.load %arg3[%c0_35, %c0_36, %c0_37, %c0_38] : memref<1x1x20x4xf32, #tpu.memory_space<vmem>>, vector<1x1x16x4xf32>
    %37 = vector.shape_cast %36 : vector<1x1x16x4xf32> to vector<16x4xf32>
    %38 = arith.truncf %37 : vector<16x4xf32> to vector<16x4xbf16>
    %c5 = arith.constant 5 : index
    %c0_39 = arith.constant 0 : index
    %c0_40 = arith.constant 0 : index
    %39 = vector.load %arg7[%c5, %c0_39, %c0_40] : memref<25x4x8xbf16, #tpu.memory_space<vmem>>, vector<1x4x8xbf16>
    %40 = vector.shape_cast %39 : vector<1x4x8xbf16> to vector<4x8xbf16>
    %cst_41 = arith.constant dense<0.000000e+00> : vector<16x8xf32>
    %41 = tpu.matmul %38, %40, %cst_41 {dimension_numbers = #tpu.dot_dimension_numbers<[1], [0], [0], [1], [0, 0, 1, 1], [], []>} : vector<16x4xbf16>, vector<4x8xbf16>, vector<16x8xf32> -> vector<16x8xf32>
    %42 = arith.addf %35, %41 : vector<16x8xf32>
    %c0_42 = arith.constant 0 : index
    %c0_43 = arith.constant 0 : index
    %c1_44 = arith.constant 1 : index
    %c0_45 = arith.constant 0 : index
    %43 = vector.load %arg3[%c0_42, %c0_43, %c1_44, %c0_45] : memref<1x1x20x4xf32, #tpu.memory_space<vmem>>, vector<1x1x16x4xf32>
    %44 = vector.shape_cast %43 : vector<1x1x16x4xf32> to vector<16x4xf32>
    %45 = arith.truncf %44 : vector<16x4xf32> to vector<16x4xbf16>
    %c6 = arith.constant 6 : index
    %c0_46 = arith.constant 0 : index
    %c0_47 = arith.constant 0 : index
    %46 = vector.load %arg7[%c6, %c0_46, %c0_47] : memref<25x4x8xbf16, #tpu.memory_space<vmem>>, vector<1x4x8xbf16>
    %47 = vector.shape_cast %46 : vector<1x4x8xbf16> to vector<4x8xbf16>
    %cst_48 = arith.constant dense<0.000000e+00> : vector<16x8xf32>
    %48 = tpu.matmul %45, %47, %cst_48 {dimension_numbers = #tpu.dot_dimension_numbers<[1], [0], [0], [1], [0, 0, 1, 1], [], []>} : vector<16x4xbf16>, vector<4x8xbf16>, vector<16x8xf32> -> vector<16x8xf32>
    %49 = arith.addf %42, %48 : vector<16x8xf32>
    %c0_49 = arith.constant 0 : index
    %c0_50 = arith.constant 0 : index
    %c2_51 = arith.constant 2 : index
    %c0_52 = arith.constant 0 : index
    %50 = vector.load %arg3[%c0_49, %c0_50, %c2_51, %c0_52] : memref<1x1x20x4xf32, #tpu.memory_space<vmem>>, vector<1x1x16x4xf32>
    %51 = vector.shape_cast %50 : vector<1x1x16x4xf32> to vector<16x4xf32>
    %52 = arith.truncf %51 : vector<16x4xf32> to vector<16x4xbf16>
    %c7 = arith.constant 7 : index
    %c0_53 = arith.constant 0 : index
    %c0_54 = arith.constant 0 : index
    %53 = vector.load %arg7[%c7, %c0_53, %c0_54] : memref<25x4x8xbf16, #tpu.memory_space<vmem>>, vector<1x4x8xbf16>
    %54 = vector.shape_cast %53 : vector<1x4x8xbf16> to vector<4x8xbf16>
    %cst_55 = arith.constant dense<0.000000e+00> : vector<16x8xf32>
    %55 = tpu.matmul %52, %54, %cst_55 {dimension_numbers = #tpu.dot_dimension_numbers<[1], [0], [0], [1], [0, 0, 1, 1], [], []>} : vector<16x4xbf16>, vector<4x8xbf16>, vector<16x8xf32> -> vector<16x8xf32>
    %56 = arith.addf %49, %55 : vector<16x8xf32>
    %c0_56 = arith.constant 0 : index
    %c0_57 = arith.constant 0 : index
    %c3_58 = arith.constant 3 : index
    %c0_59 = arith.constant 0 : index
    %57 = vector.load %arg3[%c0_56, %c0_57, %c3_58, %c0_59] : memref<1x1x20x4xf32, #tpu.memory_space<vmem>>, vector<1x1x16x4xf32>
    %58 = vector.shape_cast %57 : vector<1x1x16x4xf32> to vector<16x4xf32>
    %59 = arith.truncf %58 : vector<16x4xf32> to vector<16x4xbf16>
    %c8 = arith.constant 8 : index
    %c0_60 = arith.constant 0 : index
    %c0_61 = arith.constant 0 : index
    %60 = vector.load %arg7[%c8, %c0_60, %c0_61] : memref<25x4x8xbf16, #tpu.memory_space<vmem>>, vector<1x4x8xbf16>
    %61 = vector.shape_cast %60 : vector<1x4x8xbf16> to vector<4x8xbf16>
    %cst_62 = arith.constant dense<0.000000e+00> : vector<16x8xf32>
    %62 = tpu.matmul %59, %61, %cst_62 {dimension_numbers = #tpu.dot_dimension_numbers<[1], [0], [0], [1], [0, 0, 1, 1], [], []>} : vector<16x4xbf16>, vector<4x8xbf16>, vector<16x8xf32> -> vector<16x8xf32>
    %63 = arith.addf %56, %62 : vector<16x8xf32>
    %c0_63 = arith.constant 0 : index
    %c0_64 = arith.constant 0 : index
    %c4_65 = arith.constant 4 : index
    %c0_66 = arith.constant 0 : index
    %64 = vector.load %arg3[%c0_63, %c0_64, %c4_65, %c0_66] : memref<1x1x20x4xf32, #tpu.memory_space<vmem>>, vector<1x1x16x4xf32>
    %65 = vector.shape_cast %64 : vector<1x1x16x4xf32> to vector<16x4xf32>
    %66 = arith.truncf %65 : vector<16x4xf32> to vector<16x4xbf16>
    %c9 = arith.constant 9 : index
    %c0_67 = arith.constant 0 : index
    %c0_68 = arith.constant 0 : index
    %67 = vector.load %arg7[%c9, %c0_67, %c0_68] : memref<25x4x8xbf16, #tpu.memory_space<vmem>>, vector<1x4x8xbf16>
    %68 = vector.shape_cast %67 : vector<1x4x8xbf16> to vector<4x8xbf16>
    %cst_69 = arith.constant dense<0.000000e+00> : vector<16x8xf32>
    %69 = tpu.matmul %66, %68, %cst_69 {dimension_numbers = #tpu.dot_dimension_numbers<[1], [0], [0], [1], [0, 0, 1, 1], [], []>} : vector<16x4xbf16>, vector<4x8xbf16>, vector<16x8xf32> -> vector<16x8xf32>
    %70 = arith.addf %63, %69 : vector<16x8xf32>
    %c0_70 = arith.constant 0 : index
    %c0_71 = arith.constant 0 : index
    %c0_72 = arith.constant 0 : index
    %c0_73 = arith.constant 0 : index
    %71 = vector.load %arg4[%c0_70, %c0_71, %c0_72, %c0_73] : memref<1x1x20x4xf32, #tpu.memory_space<vmem>>, vector<1x1x16x4xf32>
    %72 = vector.shape_cast %71 : vector<1x1x16x4xf32> to vector<16x4xf32>
    %73 = arith.truncf %72 : vector<16x4xf32> to vector<16x4xbf16>
    %c10 = arith.constant 10 : index
    %c0_74 = arith.constant 0 : index
    %c0_75 = arith.constant 0 : index
    %74 = vector.load %arg7[%c10, %c0_74, %c0_75] : memref<25x4x8xbf16, #tpu.memory_space<vmem>>, vector<1x4x8xbf16>
    %75 = vector.shape_cast %74 : vector<1x4x8xbf16> to vector<4x8xbf16>
    %cst_76 = arith.constant dense<0.000000e+00> : vector<16x8xf32>
    %76 = tpu.matmul %73, %75, %cst_76 {dimension_numbers = #tpu.dot_dimension_numbers<[1], [0], [0], [1], [0, 0, 1, 1], [], []>} : vector<16x4xbf16>, vector<4x8xbf16>, vector<16x8xf32> -> vector<16x8xf32>
    %77 = arith.addf %70, %76 : vector<16x8xf32>
    %c0_77 = arith.constant 0 : index
    %c0_78 = arith.constant 0 : index
    %c1_79 = arith.constant 1 : index
    %c0_80 = arith.constant 0 : index
    %78 = vector.load %arg4[%c0_77, %c0_78, %c1_79, %c0_80] : memref<1x1x20x4xf32, #tpu.memory_space<vmem>>, vector<1x1x16x4xf32>
    %79 = vector.shape_cast %78 : vector<1x1x16x4xf32> to vector<16x4xf32>
    %80 = arith.truncf %79 : vector<16x4xf32> to vector<16x4xbf16>
    %c11 = arith.constant 11 : index
    %c0_81 = arith.constant 0 : index
    %c0_82 = arith.constant 0 : index
    %81 = vector.load %arg7[%c11, %c0_81, %c0_82] : memref<25x4x8xbf16, #tpu.memory_space<vmem>>, vector<1x4x8xbf16>
    %82 = vector.shape_cast %81 : vector<1x4x8xbf16> to vector<4x8xbf16>
    %cst_83 = arith.constant dense<0.000000e+00> : vector<16x8xf32>
    %83 = tpu.matmul %80, %82, %cst_83 {dimension_numbers = #tpu.dot_dimension_numbers<[1], [0], [0], [1], [0, 0, 1, 1], [], []>} : vector<16x4xbf16>, vector<4x8xbf16>, vector<16x8xf32> -> vector<16x8xf32>
    %84 = arith.addf %77, %83 : vector<16x8xf32>
    %c0_84 = arith.constant 0 : index
    %c0_85 = arith.constant 0 : index
    %c2_86 = arith.constant 2 : index
    %c0_87 = arith.constant 0 : index
    %85 = vector.load %arg4[%c0_84, %c0_85, %c2_86, %c0_87] : memref<1x1x20x4xf32, #tpu.memory_space<vmem>>, vector<1x1x16x4xf32>
    %86 = vector.shape_cast %85 : vector<1x1x16x4xf32> to vector<16x4xf32>
    %87 = arith.truncf %86 : vector<16x4xf32> to vector<16x4xbf16>
    %c12 = arith.constant 12 : index
    %c0_88 = arith.constant 0 : index
    %c0_89 = arith.constant 0 : index
    %88 = vector.load %arg7[%c12, %c0_88, %c0_89] : memref<25x4x8xbf16, #tpu.memory_space<vmem>>, vector<1x4x8xbf16>
    %89 = vector.shape_cast %88 : vector<1x4x8xbf16> to vector<4x8xbf16>
    %cst_90 = arith.constant dense<0.000000e+00> : vector<16x8xf32>
    %90 = tpu.matmul %87, %89, %cst_90 {dimension_numbers = #tpu.dot_dimension_numbers<[1], [0], [0], [1], [0, 0, 1, 1], [], []>} : vector<16x4xbf16>, vector<4x8xbf16>, vector<16x8xf32> -> vector<16x8xf32>
    %91 = arith.addf %84, %90 : vector<16x8xf32>
    %c0_91 = arith.constant 0 : index
    %c0_92 = arith.constant 0 : index
    %c3_93 = arith.constant 3 : index
    %c0_94 = arith.constant 0 : index
    %92 = vector.load %arg4[%c0_91, %c0_92, %c3_93, %c0_94] : memref<1x1x20x4xf32, #tpu.memory_space<vmem>>, vector<1x1x16x4xf32>
    %93 = vector.shape_cast %92 : vector<1x1x16x4xf32> to vector<16x4xf32>
    %94 = arith.truncf %93 : vector<16x4xf32> to vector<16x4xbf16>
    %c13 = arith.constant 13 : index
    %c0_95 = arith.constant 0 : index
    %c0_96 = arith.constant 0 : index
    %95 = vector.load %arg7[%c13, %c0_95, %c0_96] : memref<25x4x8xbf16, #tpu.memory_space<vmem>>, vector<1x4x8xbf16>
    %96 = vector.shape_cast %95 : vector<1x4x8xbf16> to vector<4x8xbf16>
    %cst_97 = arith.constant dense<0.000000e+00> : vector<16x8xf32>
    %97 = tpu.matmul %94, %96, %cst_97 {dimension_numbers = #tpu.dot_dimension_numbers<[1], [0], [0], [1], [0, 0, 1, 1], [], []>} : vector<16x4xbf16>, vector<4x8xbf16>, vector<16x8xf32> -> vector<16x8xf32>
    %98 = arith.addf %91, %97 : vector<16x8xf32>
    %c0_98 = arith.constant 0 : index
    %c0_99 = arith.constant 0 : index
    %c4_100 = arith.constant 4 : index
    %c0_101 = arith.constant 0 : index
    %99 = vector.load %arg4[%c0_98, %c0_99, %c4_100, %c0_101] : memref<1x1x20x4xf32, #tpu.memory_space<vmem>>, vector<1x1x16x4xf32>
    %100 = vector.shape_cast %99 : vector<1x1x16x4xf32> to vector<16x4xf32>
    %101 = arith.truncf %100 : vector<16x4xf32> to vector<16x4xbf16>
    %c14 = arith.constant 14 : index
    %c0_102 = arith.constant 0 : index
    %c0_103 = arith.constant 0 : index
    %102 = vector.load %arg7[%c14, %c0_102, %c0_103] : memref<25x4x8xbf16, #tpu.memory_space<vmem>>, vector<1x4x8xbf16>
    %103 = vector.shape_cast %102 : vector<1x4x8xbf16> to vector<4x8xbf16>
    %cst_104 = arith.constant dense<0.000000e+00> : vector<16x8xf32>
    %104 = tpu.matmul %101, %103, %cst_104 {dimension_numbers = #tpu.dot_dimension_numbers<[1], [0], [0], [1], [0, 0, 1, 1], [], []>} : vector<16x4xbf16>, vector<4x8xbf16>, vector<16x8xf32> -> vector<16x8xf32>
    %105 = arith.addf %98, %104 : vector<16x8xf32>
    %c0_105 = arith.constant 0 : index
    %c0_106 = arith.constant 0 : index
    %c0_107 = arith.constant 0 : index
    %c0_108 = arith.constant 0 : index
    %106 = vector.load %arg5[%c0_105, %c0_106, %c0_107, %c0_108] : memref<1x1x20x4xf32, #tpu.memory_space<vmem>>, vector<1x1x16x4xf32>
    %107 = vector.shape_cast %106 : vector<1x1x16x4xf32> to vector<16x4xf32>
    %108 = arith.truncf %107 : vector<16x4xf32> to vector<16x4xbf16>
    %c15 = arith.constant 15 : index
    %c0_109 = arith.constant 0 : index
    %c0_110 = arith.constant 0 : index
    %109 = vector.load %arg7[%c15, %c0_109, %c0_110] : memref<25x4x8xbf16, #tpu.memory_space<vmem>>, vector<1x4x8xbf16>
    %110 = vector.shape_cast %109 : vector<1x4x8xbf16> to vector<4x8xbf16>
    %cst_111 = arith.constant dense<0.000000e+00> : vector<16x8xf32>
    %111 = tpu.matmul %108, %110, %cst_111 {dimension_numbers = #tpu.dot_dimension_numbers<[1], [0], [0], [1], [0, 0, 1, 1], [], []>} : vector<16x4xbf16>, vector<4x8xbf16>, vector<16x8xf32> -> vector<16x8xf32>
    %112 = arith.addf %105, %111 : vector<16x8xf32>
    %c0_112 = arith.constant 0 : index
    %c0_113 = arith.constant 0 : index
    %c1_114 = arith.constant 1 : index
    %c0_115 = arith.constant 0 : index
    %113 = vector.load %arg5[%c0_112, %c0_113, %c1_114, %c0_115] : memref<1x1x20x4xf32, #tpu.memory_space<vmem>>, vector<1x1x16x4xf32>
    %114 = vector.shape_cast %113 : vector<1x1x16x4xf32> to vector<16x4xf32>
    %115 = arith.truncf %114 : vector<16x4xf32> to vector<16x4xbf16>
    %c16 = arith.constant 16 : index
    %c0_116 = arith.constant 0 : index
    %c0_117 = arith.constant 0 : index
    %116 = vector.load %arg7[%c16, %c0_116, %c0_117] : memref<25x4x8xbf16, #tpu.memory_space<vmem>>, vector<1x4x8xbf16>
    %117 = vector.shape_cast %116 : vector<1x4x8xbf16> to vector<4x8xbf16>
    %cst_118 = arith.constant dense<0.000000e+00> : vector<16x8xf32>
    %118 = tpu.matmul %115, %117, %cst_118 {dimension_numbers = #tpu.dot_dimension_numbers<[1], [0], [0], [1], [0, 0, 1, 1], [], []>} : vector<16x4xbf16>, vector<4x8xbf16>, vector<16x8xf32> -> vector<16x8xf32>
    %119 = arith.addf %112, %118 : vector<16x8xf32>
    %c0_119 = arith.constant 0 : index
    %c0_120 = arith.constant 0 : index
    %c2_121 = arith.constant 2 : index
    %c0_122 = arith.constant 0 : index
    %120 = vector.load %arg5[%c0_119, %c0_120, %c2_121, %c0_122] : memref<1x1x20x4xf32, #tpu.memory_space<vmem>>, vector<1x1x16x4xf32>
    %121 = vector.shape_cast %120 : vector<1x1x16x4xf32> to vector<16x4xf32>
    %122 = arith.truncf %121 : vector<16x4xf32> to vector<16x4xbf16>
    %c17 = arith.constant 17 : index
    %c0_123 = arith.constant 0 : index
    %c0_124 = arith.constant 0 : index
    %123 = vector.load %arg7[%c17, %c0_123, %c0_124] : memref<25x4x8xbf16, #tpu.memory_space<vmem>>, vector<1x4x8xbf16>
    %124 = vector.shape_cast %123 : vector<1x4x8xbf16> to vector<4x8xbf16>
    %cst_125 = arith.constant dense<0.000000e+00> : vector<16x8xf32>
    %125 = tpu.matmul %122, %124, %cst_125 {dimension_numbers = #tpu.dot_dimension_numbers<[1], [0], [0], [1], [0, 0, 1, 1], [], []>} : vector<16x4xbf16>, vector<4x8xbf16>, vector<16x8xf32> -> vector<16x8xf32>
    %126 = arith.addf %119, %125 : vector<16x8xf32>
    %c0_126 = arith.constant 0 : index
    %c0_127 = arith.constant 0 : index
    %c3_128 = arith.constant 3 : index
    %c0_129 = arith.constant 0 : index
    %127 = vector.load %arg5[%c0_126, %c0_127, %c3_128, %c0_129] : memref<1x1x20x4xf32, #tpu.memory_space<vmem>>, vector<1x1x16x4xf32>
    %128 = vector.shape_cast %127 : vector<1x1x16x4xf32> to vector<16x4xf32>
    %129 = arith.truncf %128 : vector<16x4xf32> to vector<16x4xbf16>
    %c18 = arith.constant 18 : index
    %c0_130 = arith.constant 0 : index
    %c0_131 = arith.constant 0 : index
    %130 = vector.load %arg7[%c18, %c0_130, %c0_131] : memref<25x4x8xbf16, #tpu.memory_space<vmem>>, vector<1x4x8xbf16>
    %131 = vector.shape_cast %130 : vector<1x4x8xbf16> to vector<4x8xbf16>
    %cst_132 = arith.constant dense<0.000000e+00> : vector<16x8xf32>
    %132 = tpu.matmul %129, %131, %cst_132 {dimension_numbers = #tpu.dot_dimension_numbers<[1], [0], [0], [1], [0, 0, 1, 1], [], []>} : vector<16x4xbf16>, vector<4x8xbf16>, vector<16x8xf32> -> vector<16x8xf32>
    %133 = arith.addf %126, %132 : vector<16x8xf32>
    %c0_133 = arith.constant 0 : index
    %c0_134 = arith.constant 0 : index
    %c4_135 = arith.constant 4 : index
    %c0_136 = arith.constant 0 : index
    %134 = vector.load %arg5[%c0_133, %c0_134, %c4_135, %c0_136] : memref<1x1x20x4xf32, #tpu.memory_space<vmem>>, vector<1x1x16x4xf32>
    %135 = vector.shape_cast %134 : vector<1x1x16x4xf32> to vector<16x4xf32>
    %136 = arith.truncf %135 : vector<16x4xf32> to vector<16x4xbf16>
    %c19 = arith.constant 19 : index
    %c0_137 = arith.constant 0 : index
    %c0_138 = arith.constant 0 : index
    %137 = vector.load %arg7[%c19, %c0_137, %c0_138] : memref<25x4x8xbf16, #tpu.memory_space<vmem>>, vector<1x4x8xbf16>
    %138 = vector.shape_cast %137 : vector<1x4x8xbf16> to vector<4x8xbf16>
    %cst_139 = arith.constant dense<0.000000e+00> : vector<16x8xf32>
    %139 = tpu.matmul %136, %138, %cst_139 {dimension_numbers = #tpu.dot_dimension_numbers<[1], [0], [0], [1], [0, 0, 1, 1], [], []>} : vector<16x4xbf16>, vector<4x8xbf16>, vector<16x8xf32> -> vector<16x8xf32>
    %140 = arith.addf %133, %139 : vector<16x8xf32>
    %c0_140 = arith.constant 0 : index
    %c0_141 = arith.constant 0 : index
    %c0_142 = arith.constant 0 : index
    %c0_143 = arith.constant 0 : index
    %141 = vector.load %arg6[%c0_140, %c0_141, %c0_142, %c0_143] : memref<1x1x20x4xf32, #tpu.memory_space<vmem>>, vector<1x1x16x4xf32>
    %142 = vector.shape_cast %141 : vector<1x1x16x4xf32> to vector<16x4xf32>
    %143 = arith.truncf %142 : vector<16x4xf32> to vector<16x4xbf16>
    %c20 = arith.constant 20 : index
    %c0_144 = arith.constant 0 : index
    %c0_145 = arith.constant 0 : index
    %144 = vector.load %arg7[%c20, %c0_144, %c0_145] : memref<25x4x8xbf16, #tpu.memory_space<vmem>>, vector<1x4x8xbf16>
    %145 = vector.shape_cast %144 : vector<1x4x8xbf16> to vector<4x8xbf16>
    %cst_146 = arith.constant dense<0.000000e+00> : vector<16x8xf32>
    %146 = tpu.matmul %143, %145, %cst_146 {dimension_numbers = #tpu.dot_dimension_numbers<[1], [0], [0], [1], [0, 0, 1, 1], [], []>} : vector<16x4xbf16>, vector<4x8xbf16>, vector<16x8xf32> -> vector<16x8xf32>
    %147 = arith.addf %140, %146 : vector<16x8xf32>
    %c0_147 = arith.constant 0 : index
    %c0_148 = arith.constant 0 : index
    %c1_149 = arith.constant 1 : index
    %c0_150 = arith.constant 0 : index
    %148 = vector.load %arg6[%c0_147, %c0_148, %c1_149, %c0_150] : memref<1x1x20x4xf32, #tpu.memory_space<vmem>>, vector<1x1x16x4xf32>
    %149 = vector.shape_cast %148 : vector<1x1x16x4xf32> to vector<16x4xf32>
    %150 = arith.truncf %149 : vector<16x4xf32> to vector<16x4xbf16>
    %c21 = arith.constant 21 : index
    %c0_151 = arith.constant 0 : index
    %c0_152 = arith.constant 0 : index
    %151 = vector.load %arg7[%c21, %c0_151, %c0_152] : memref<25x4x8xbf16, #tpu.memory_space<vmem>>, vector<1x4x8xbf16>
    %152 = vector.shape_cast %151 : vector<1x4x8xbf16> to vector<4x8xbf16>
    %cst_153 = arith.constant dense<0.000000e+00> : vector<16x8xf32>
    %153 = tpu.matmul %150, %152, %cst_153 {dimension_numbers = #tpu.dot_dimension_numbers<[1], [0], [0], [1], [0, 0, 1, 1], [], []>} : vector<16x4xbf16>, vector<4x8xbf16>, vector<16x8xf32> -> vector<16x8xf32>
    %154 = arith.addf %147, %153 : vector<16x8xf32>
    %c0_154 = arith.constant 0 : index
    %c0_155 = arith.constant 0 : index
    %c2_156 = arith.constant 2 : index
    %c0_157 = arith.constant 0 : index
    %155 = vector.load %arg6[%c0_154, %c0_155, %c2_156, %c0_157] : memref<1x1x20x4xf32, #tpu.memory_space<vmem>>, vector<1x1x16x4xf32>
    %156 = vector.shape_cast %155 : vector<1x1x16x4xf32> to vector<16x4xf32>
    %157 = arith.truncf %156 : vector<16x4xf32> to vector<16x4xbf16>
    %c22 = arith.constant 22 : index
    %c0_158 = arith.constant 0 : index
    %c0_159 = arith.constant 0 : index
    %158 = vector.load %arg7[%c22, %c0_158, %c0_159] : memref<25x4x8xbf16, #tpu.memory_space<vmem>>, vector<1x4x8xbf16>
    %159 = vector.shape_cast %158 : vector<1x4x8xbf16> to vector<4x8xbf16>
    %cst_160 = arith.constant dense<0.000000e+00> : vector<16x8xf32>
    %160 = tpu.matmul %157, %159, %cst_160 {dimension_numbers = #tpu.dot_dimension_numbers<[1], [0], [0], [1], [0, 0, 1, 1], [], []>} : vector<16x4xbf16>, vector<4x8xbf16>, vector<16x8xf32> -> vector<16x8xf32>
    %161 = arith.addf %154, %160 : vector<16x8xf32>
    %c0_161 = arith.constant 0 : index
    %c0_162 = arith.constant 0 : index
    %c3_163 = arith.constant 3 : index
    %c0_164 = arith.constant 0 : index
    %162 = vector.load %arg6[%c0_161, %c0_162, %c3_163, %c0_164] : memref<1x1x20x4xf32, #tpu.memory_space<vmem>>, vector<1x1x16x4xf32>
    %163 = vector.shape_cast %162 : vector<1x1x16x4xf32> to vector<16x4xf32>
    %164 = arith.truncf %163 : vector<16x4xf32> to vector<16x4xbf16>
    %c23 = arith.constant 23 : index
    %c0_165 = arith.constant 0 : index
    %c0_166 = arith.constant 0 : index
    %165 = vector.load %arg7[%c23, %c0_165, %c0_166] : memref<25x4x8xbf16, #tpu.memory_space<vmem>>, vector<1x4x8xbf16>
    %166 = vector.shape_cast %165 : vector<1x4x8xbf16> to vector<4x8xbf16>
    %cst_167 = arith.constant dense<0.000000e+00> : vector<16x8xf32>
    %167 = tpu.matmul %164, %166, %cst_167 {dimension_numbers = #tpu.dot_dimension_numbers<[1], [0], [0], [1], [0, 0, 1, 1], [], []>} : vector<16x4xbf16>, vector<4x8xbf16>, vector<16x8xf32> -> vector<16x8xf32>
    %168 = arith.addf %161, %167 : vector<16x8xf32>
    %c0_168 = arith.constant 0 : index
    %c0_169 = arith.constant 0 : index
    %c4_170 = arith.constant 4 : index
    %c0_171 = arith.constant 0 : index
    %169 = vector.load %arg6[%c0_168, %c0_169, %c4_170, %c0_171] : memref<1x1x20x4xf32, #tpu.memory_space<vmem>>, vector<1x1x16x4xf32>
    %170 = vector.shape_cast %169 : vector<1x1x16x4xf32> to vector<16x4xf32>
    %171 = arith.truncf %170 : vector<16x4xf32> to vector<16x4xbf16>
    %c24 = arith.constant 24 : index
    %c0_172 = arith.constant 0 : index
    %c0_173 = arith.constant 0 : index
    %172 = vector.load %arg7[%c24, %c0_172, %c0_173] : memref<25x4x8xbf16, #tpu.memory_space<vmem>>, vector<1x4x8xbf16>
    %173 = vector.shape_cast %172 : vector<1x4x8xbf16> to vector<4x8xbf16>
    %cst_174 = arith.constant dense<0.000000e+00> : vector<16x8xf32>
    %174 = tpu.matmul %171, %173, %cst_174 {dimension_numbers = #tpu.dot_dimension_numbers<[1], [0], [0], [1], [0, 0, 1, 1], [], []>} : vector<16x4xbf16>, vector<4x8xbf16>, vector<16x8xf32> -> vector<16x8xf32>
    %175 = arith.addf %168, %174 : vector<16x8xf32>
    %c0_175 = arith.constant 0 : index
    %c0_176 = arith.constant 0 : index
    %176 = vector.load %arg8[%c0_175, %c0_176] : memref<1x8xf32, #tpu.memory_space<vmem>>, vector<1x8xf32>
    %177 = vector.broadcast %176 : vector<1x8xf32> to vector<16x8xf32>
    %178 = arith.addf %175, %177 : vector<16x8xf32>
    %cst_177 = arith.constant 0.000000e+00 : f32
    %179 = vector.broadcast %cst_177 : f32 to vector<16x8xf32>
    %180 = arith.maximumf %178, %179 : vector<16x8xf32>
    %c0_178 = arith.constant 0 : index
    %c0_179 = arith.constant 0 : index
    %c0_180 = arith.constant 0 : index
    %c0_181 = arith.constant 0 : index
    %181 = vector.load %arg9[%c0_178, %c0_179, %c0_180, %c0_181] : memref<1x1x16x8xf32, #tpu.memory_space<vmem>>, vector<1x1x16x8xf32>
    %182 = vector.shape_cast %181 : vector<1x1x16x8xf32> to vector<16x8xf32>
    %183 = vector.shape_cast %180 : vector<16x8xf32> to vector<1x1x16x8xf32>
    tpu.vector_store %arg9[%c0_178, %c0_179, %c0_180, %c0_181], %183 {strides = array<i32>} : memref<1x1x16x8xf32, #tpu.memory_space<vmem>>, vector<1x1x16x8xf32>,
    return
  }
  func.func @transform_0(%arg0: i32, %arg1: i32) -> (i32, i32, i32, i32) {
    %c0_i32 = arith.constant 0 : i32
    %0 = arith.addi %arg1, %c0_i32 : i32
    %c0_i32_0 = arith.constant 0 : i32
    %c0_i32_1 = arith.constant 0 : i32
    %c0_i32_2 = arith.constant 0 : i32
    return %arg0, %0, %c0_i32_0, %c0_i32_1 : i32, i32, i32, i32
  }
  func.func @transform_1(%arg0: i32, %arg1: i32) -> (i32, i32, i32, i32) {
    %c1_i32 = arith.constant 1 : i32
    %0 = arith.addi %arg1, %c1_i32 : i32
    %c0_i32 = arith.constant 0 : i32
    %c0_i32_0 = arith.constant 0 : i32
    %c0_i32_1 = arith.constant 0 : i32
    return %arg0, %0, %c0_i32, %c0_i32_0 : i32, i32, i32, i32
  }
  func.func @transform_2(%arg0: i32, %arg1: i32) -> (i32, i32, i32, i32) {
    %c2_i32 = arith.constant 2 : i32
    %0 = arith.addi %arg1, %c2_i32 : i32
    %c0_i32 = arith.constant 0 : i32
    %c0_i32_0 = arith.constant 0 : i32
    %c0_i32_1 = arith.constant 0 : i32
    return %arg0, %0, %c0_i32, %c0_i32_0 : i32, i32, i32, i32
  }
  func.func @transform_3(%arg0: i32, %arg1: i32) -> (i32, i32, i32, i32) {
    %c3_i32 = arith.constant 3 : i32
    %0 = arith.addi %arg1, %c3_i32 : i32
    %c0_i32 = arith.constant 0 : i32
    %c0_i32_0 = arith.constant 0 : i32
    %c0_i32_1 = arith.constant 0 : i32
    return %arg0, %0, %c0_i32, %c0_i32_0 : i32, i32, i32, i32
  }
  func.func @transform_4(%arg0: i32, %arg1: i32) -> (i32, i32, i32, i32) {
    %c4_i32 = arith.constant 4 : i32
    %0 = arith.addi %arg1, %c4_i32 : i32
    %c0_i32 = arith.constant 0 : i32
    %c0_i32_0 = arith.constant 0 : i32
    %c0_i32_1 = arith.constant 0 : i32
    return %arg0, %0, %c0_i32, %c0_i32_0 : i32, i32, i32, i32
  }
  func.func @transform_5(%arg0: i32, %arg1: i32) -> (i32, i32, i32) {
    %c0_i32 = arith.constant 0 : i32
    %c0_i32_0 = arith.constant 0 : i32
    %c0_i32_1 = arith.constant 0 : i32
    %c0_i32_2 = arith.constant 0 : i32
    return %c0_i32, %c0_i32_0, %c0_i32_1 : i32, i32, i32
  }
  func.func @transform_6(%arg0: i32, %arg1: i32) -> (i32, i32) {
    %c0_i32 = arith.constant 0 : i32
    %c0_i32_0 = arith.constant 0 : i32
    %c0_i32_1 = arith.constant 0 : i32
    return %c0_i32, %c0_i32_0 : i32, i32
  }
  func.func @transform_7(%arg0: i32, %arg1: i32) -> (i32, i32, i32, i32) {
    %c0_i32 = arith.constant 0 : i32
    %c0_i32_0 = arith.constant 0 : i32
    %c0_i32_1 = arith.constant 0 : i32
    return %arg0, %arg1, %c0_i32, %c0_i32_0 : i32, i32, i32, i32
  }
}

module attributes {stable_mosaic.version = 11 : i64} {
  func.func @_maxpool3x3_kernel(%arg0: i32, %arg1: i32, %arg2: memref<1x1x16x4xf32, #tpu.memory_space<vmem>>, %arg3: memref<1x1x16x4xf32, #tpu.memory_space<vmem>>, %arg4: memref<1x1x16x4xf32, #tpu.memory_space<vmem>>, %arg5: memref<1x1x14x4xf32, #tpu.memory_space<vmem>>) attributes {dimension_semantics = [#tpu.dimension_semantics<parallel>, #tpu.dimension_semantics<parallel>], iteration_bounds = array<i64: 2, 14>, scalar_prefetch = 0 : i64, scratch_operands = 0 : i64, tpu.core_type = #tpu.core_type<tc>, window_params = [{transform_indices = @transform_0, window_bounds = array<i64: 1, 1, 16, 4>}, {transform_indices = @transform_1, window_bounds = array<i64: 1, 1, 16, 4>}, {transform_indices = @transform_2, window_bounds = array<i64: 1, 1, 16, 4>}, {transform_indices = @transform_3, window_bounds = array<i64: 1, 1, 14, 4>}]} {
    %c0 = arith.constant 0 : index
    %c0_0 = arith.constant 0 : index
    %c0_1 = arith.constant 0 : index
    %c0_2 = arith.constant 0 : index
    %0 = vector.load %arg2[%c0, %c0_0, %c0_1, %c0_2] : memref<1x1x16x4xf32, #tpu.memory_space<vmem>>, vector<1x1x14x4xf32>
    %1 = vector.shape_cast %0 : vector<1x1x14x4xf32> to vector<14x4xf32>
    %c0_3 = arith.constant 0 : index
    %c0_4 = arith.constant 0 : index
    %c1 = arith.constant 1 : index
    %c0_5 = arith.constant 0 : index
    %2 = vector.load %arg2[%c0_3, %c0_4, %c1, %c0_5] : memref<1x1x16x4xf32, #tpu.memory_space<vmem>>, vector<1x1x14x4xf32>
    %3 = vector.shape_cast %2 : vector<1x1x14x4xf32> to vector<14x4xf32>
    %4 = arith.maximumf %1, %3 : vector<14x4xf32>
    %c0_6 = arith.constant 0 : index
    %c0_7 = arith.constant 0 : index
    %c2 = arith.constant 2 : index
    %c0_8 = arith.constant 0 : index
    %5 = vector.load %arg2[%c0_6, %c0_7, %c2, %c0_8] : memref<1x1x16x4xf32, #tpu.memory_space<vmem>>, vector<1x1x14x4xf32>
    %6 = vector.shape_cast %5 : vector<1x1x14x4xf32> to vector<14x4xf32>
    %7 = arith.maximumf %4, %6 : vector<14x4xf32>
    %c0_9 = arith.constant 0 : index
    %c0_10 = arith.constant 0 : index
    %c0_11 = arith.constant 0 : index
    %c0_12 = arith.constant 0 : index
    %8 = vector.load %arg3[%c0_9, %c0_10, %c0_11, %c0_12] : memref<1x1x16x4xf32, #tpu.memory_space<vmem>>, vector<1x1x14x4xf32>
    %9 = vector.shape_cast %8 : vector<1x1x14x4xf32> to vector<14x4xf32>
    %10 = arith.maximumf %7, %9 : vector<14x4xf32>
    %c0_13 = arith.constant 0 : index
    %c0_14 = arith.constant 0 : index
    %c1_15 = arith.constant 1 : index
    %c0_16 = arith.constant 0 : index
    %11 = vector.load %arg3[%c0_13, %c0_14, %c1_15, %c0_16] : memref<1x1x16x4xf32, #tpu.memory_space<vmem>>, vector<1x1x14x4xf32>
    %12 = vector.shape_cast %11 : vector<1x1x14x4xf32> to vector<14x4xf32>
    %13 = arith.maximumf %10, %12 : vector<14x4xf32>
    %c0_17 = arith.constant 0 : index
    %c0_18 = arith.constant 0 : index
    %c2_19 = arith.constant 2 : index
    %c0_20 = arith.constant 0 : index
    %14 = vector.load %arg3[%c0_17, %c0_18, %c2_19, %c0_20] : memref<1x1x16x4xf32, #tpu.memory_space<vmem>>, vector<1x1x14x4xf32>
    %15 = vector.shape_cast %14 : vector<1x1x14x4xf32> to vector<14x4xf32>
    %16 = arith.maximumf %13, %15 : vector<14x4xf32>
    %c0_21 = arith.constant 0 : index
    %c0_22 = arith.constant 0 : index
    %c0_23 = arith.constant 0 : index
    %c0_24 = arith.constant 0 : index
    %17 = vector.load %arg4[%c0_21, %c0_22, %c0_23, %c0_24] : memref<1x1x16x4xf32, #tpu.memory_space<vmem>>, vector<1x1x14x4xf32>
    %18 = vector.shape_cast %17 : vector<1x1x14x4xf32> to vector<14x4xf32>
    %19 = arith.maximumf %16, %18 : vector<14x4xf32>
    %c0_25 = arith.constant 0 : index
    %c0_26 = arith.constant 0 : index
    %c1_27 = arith.constant 1 : index
    %c0_28 = arith.constant 0 : index
    %20 = vector.load %arg4[%c0_25, %c0_26, %c1_27, %c0_28] : memref<1x1x16x4xf32, #tpu.memory_space<vmem>>, vector<1x1x14x4xf32>
    %21 = vector.shape_cast %20 : vector<1x1x14x4xf32> to vector<14x4xf32>
    %22 = arith.maximumf %19, %21 : vector<14x4xf32>
    %c0_29 = arith.constant 0 : index
    %c0_30 = arith.constant 0 : index
    %c2_31 = arith.constant 2 : index
    %c0_32 = arith.constant 0 : index
    %23 = vector.load %arg4[%c0_29, %c0_30, %c2_31, %c0_32] : memref<1x1x16x4xf32, #tpu.memory_space<vmem>>, vector<1x1x14x4xf32>
    %24 = vector.shape_cast %23 : vector<1x1x14x4xf32> to vector<14x4xf32>
    %25 = arith.maximumf %22, %24 : vector<14x4xf32>
    %c0_33 = arith.constant 0 : index
    %c0_34 = arith.constant 0 : index
    %c0_35 = arith.constant 0 : index
    %c0_36 = arith.constant 0 : index
    %26 = vector.load %arg5[%c0_33, %c0_34, %c0_35, %c0_36] : memref<1x1x14x4xf32, #tpu.memory_space<vmem>>, vector<1x1x14x4xf32>
    %27 = vector.shape_cast %26 : vector<1x1x14x4xf32> to vector<14x4xf32>
    %28 = vector.shape_cast %25 : vector<14x4xf32> to vector<1x1x14x4xf32>
    tpu.vector_store %arg5[%c0_33, %c0_34, %c0_35, %c0_36], %28 {strides = array<i32>} : memref<1x1x14x4xf32, #tpu.memory_space<vmem>>, vector<1x1x14x4xf32>,
    return
  }
  func.func @transform_0(%arg0: i32, %arg1: i32) -> (i32, i32, i32, i32) {
    %c0_i32 = arith.constant 0 : i32
    %0 = arith.addi %arg1, %c0_i32 : i32
    %c0_i32_0 = arith.constant 0 : i32
    %c0_i32_1 = arith.constant 0 : i32
    %c0_i32_2 = arith.constant 0 : i32
    return %arg0, %0, %c0_i32_0, %c0_i32_1 : i32, i32, i32, i32
  }
  func.func @transform_1(%arg0: i32, %arg1: i32) -> (i32, i32, i32, i32) {
    %c1_i32 = arith.constant 1 : i32
    %0 = arith.addi %arg1, %c1_i32 : i32
    %c0_i32 = arith.constant 0 : i32
    %c0_i32_0 = arith.constant 0 : i32
    %c0_i32_1 = arith.constant 0 : i32
    return %arg0, %0, %c0_i32, %c0_i32_0 : i32, i32, i32, i32
  }
  func.func @transform_2(%arg0: i32, %arg1: i32) -> (i32, i32, i32, i32) {
    %c2_i32 = arith.constant 2 : i32
    %0 = arith.addi %arg1, %c2_i32 : i32
    %c0_i32 = arith.constant 0 : i32
    %c0_i32_0 = arith.constant 0 : i32
    %c0_i32_1 = arith.constant 0 : i32
    return %arg0, %0, %c0_i32, %c0_i32_0 : i32, i32, i32, i32
  }
  func.func @transform_3(%arg0: i32, %arg1: i32) -> (i32, i32, i32, i32) {
    %c0_i32 = arith.constant 0 : i32
    %c0_i32_0 = arith.constant 0 : i32
    %c0_i32_1 = arith.constant 0 : i32
    return %arg0, %arg1, %c0_i32, %c0_i32_0 : i32, i32, i32, i32
  }
}

</mosaic_0001>

<bundles_post_ra>
// kernel: inception_forward.5
= control target key start
LH: loop header
LB: loop body
LE: loop exit
PB: predicated region body
PF: predicated region fallthrough
CT: control target
= control target key end

     0   :  { %s911_s12 = smov 0   ;;  %s913_s13 = smov 0   ;;  %s1056_s0 = inlined_call_operand.vmem [shape: bf16[512,4], index: 0, kind: input, shape index: {}]   ;;  %s1057_s1 = inlined_call_operand.vmem [shape: bf16[4,128], index: 1, kind: input, shape index: {}]   ;;  %s1058_s2 = inlined_call_operand.vmem [shape: f32[1,128], index: 2, kind: input, shape index: {}]   ;;  %s1059_s3 = inlined_call_operand.vmem [shape: f32[512,128], index: 3, kind: output, shape index: {}]  }
   0x1   :  { %s915_s14 = smov 0  }
   0x2 LB: > { %s25_s15 = sadd.s32 1, %s885_s13  ;;  %p732_p0 = scmp.ge.s32.totalorder %s889_s14, 1  ;;  %s889_s14 = sphi %s915_s14, %s13_s14   ;;  %s885_s13 = sphi %s913_s13, %s1061_s13   ;;  %s881_s12 = sphi %s911_s12, %s1060_s12  }
   0x3   : > { %p27_p1 = scmp.ge.s32.totalorder %s25_s15, 2  ;;  %p169_p2 = scmp.lt.s32.totalorder %s889_s14, 3 }
   0x5   : > { %s1063_s15 = smov (%p27_p1, %s25_s15), 0  ;;  %p170_p3 = pnand %p732_p0, %p169_p2 }
   0x6   : > { %v258_v0 = vld [vmem:[%s1057_s1] sm:$0x3] (!%p170_p3)  ;;  %vm395_vm0 = vcmask (!%p170_p3), 1041408   ;;  %s733_s18 = sshll.u32 (!%p170_p3), %s881_s12, 5  ;;  %vm346_vm1 = vcmask (!%p170_p3), 31744  }
   0x7   : > { %173 = sbr.rel (%p170_p3) target bundleno = 264 (0x108), region = 32  ;;  %825 = vmatprep.subr.msk.bf16.mxu0 (!%p170_p3), %vm395_vm0, %v258_v0  ;;  %826 = vmatprep.subr.msk.bf16.mxu1 (!%p170_p3), %vm395_vm0, %v258_v0  ;;  %v397_v1 = vsel (!%p170_p3), %vm395_vm0, %v258_v0, 0  ;;  %p204_p4 = scmp.lt.s32.totalorder (!%p170_p3), %s733_s18, 63  ;;  %v975_v18 = vld [vmem:[%s1058_s2] ss:$0 sm:$0xff] (!%p170_p3) }
   0x8   : > { %790 = vmatpush3.bf16.msra.mxu0 (!%p170_p3), %v397_v1  ;;  %824 = vmatpush3.bf16.msra.mxu1 (!%p170_p3), %v397_v1 }
   0xe   : > { %s1065_s18 = smov (!%p204_p4, %s733_s18), 63 }
   0xf   : > { %s734_s19 = sshll.u32 %s1065_s18, 2  ;;  %s736_s25 = sshll.u32 %s1065_s18, 3 }
  0x10   : > { %s938_s22 = scalar_lea.vmem %s1056_s0, %s734_s19  ;;  %s982_s28 = scalar_lea.vmem %s1059_s3, %s736_s25 }
  0x11   : > { %v851_v2 = vld [vmem:[%s938_s22] sm:$0xff]   ;;  %v853_v4 = vld [vmem:[%s938_s22 + $0x8] sm:$0xff]   ;;  %v855_v6 = vld [vmem:[%s938_s22 + $0x10] sm:$0xff]  }
  0x12   : > { %v852_v3 = vld [vmem:[%s938_s22 + $0x40] sm:$0xff]   ;;  %791 = vmatprep.mubr.msk.bf16.mxu0 %vm346_vm1, %v851_v2  ;;  %v854_v5 = vld [vmem:[%s938_s22 + $0x48] sm:$0xff]   ;;  %v856_v7 = vld [vmem:[%s938_s22 + $0x50] sm:$0xff]  }
  0x13   : > { %807 = vmatprep.mubr.msk.bf16.mxu1 %vm346_vm1, %v852_v3  ;;  %792 = vmatmul.mubr.msk.bf16.vlgmr.msra.gmra.mrb[0].mxu0 %vm346_vm1, %v853_v4  ;;  %v857_v8 = vld [vmem:[%s938_s22 + $0x18] sm:$0xff]   ;;  %v859_v10 = vld [vmem:[%s938_s22 + $0x20] sm:$0xff]   ;;  %v861_v12 = vld [vmem:[%s938_s22 + $0x28] sm:$0xff]  }
  0x14   : > { %808 = vmatmul.mubr.msk.bf16.vlgmr.msra.gmra.mrb[0].mxu1 %vm346_vm1, %v854_v5  ;;  %795 = vmatprep.mubr.msk.bf16.mxu0 %vm346_vm1, %v855_v6  ;;  %v858_v9 = vld [vmem:[%s938_s22 + $0x58] sm:$0xff]   ;;  %v860_v11 = vld [vmem:[%s938_s22 + $0x60] sm:$0xff]   ;;  %v862_v13 = vld [vmem:[%s938_s22 + $0x68] sm:$0xff]  }
  0x15   : > { %811 = vmatprep.mubr.msk.bf16.mxu1 %vm346_vm1, %v856_v7  ;;  %v863_v14 = vld [vmem:[%s938_s22 + $0x30] sm:$0xff]   ;;  %v865_v16 = vld [vmem:[%s938_s22 + $0x38] sm:$0xff]  }
  0x16   : > { %v864_v15 = vld [vmem:[%s938_s22 + $0x70] sm:$0xff]   ;;  %v866_v17 = vld [vmem:[%s938_s22 + $0x78] sm:$0xff]  }
  0x1b   : > { %796 = vmatmul.mubr.msk.bf16.gmra.mrb[4].mxu0 %vm346_vm1, %v857_v8 }
  0x1c   : > { %812 = vmatmul.mubr.msk.bf16.gmra.mrb[4].mxu1 %vm346_vm1, %v858_v9  ;;  %799 = vmatprep.mubr.msk.bf16.mxu0 %vm346_vm1, %v859_v10 }
  0x1d   : > { %815 = vmatprep.mubr.msk.bf16.mxu1 %vm346_vm1, %v860_v11 }
  0x23   : > { %800 = vmatmul.mubr.msk.bf16.gmra.mrb[8].mxu0 %vm346_vm1, %v861_v12 }
  0x24   : > { %816 = vmatmul.mubr.msk.bf16.gmra.mrb[8].mxu1 %vm346_vm1, %v862_v13  ;;  %803 = vmatprep.mubr.msk.bf16.mxu0 %vm346_vm1, %v863_v14 }
  0x25   : > { %819 = vmatprep.mubr.msk.bf16.mxu1 %vm346_vm1, %v864_v15 }
  0x2b   : > { %804 = vmatmul.mubr.msk.bf16.gmra.mrb[12].mxu0 %vm346_vm1, %v865_v16 }
  0x2c   : > { %820 = vmatmul.mubr.msk.bf16.gmra.mrb[12].mxu1 %vm346_vm1, %v866_v17 }
  0xe6   : > { %v793_v19 = vpop.f32.mrb[0].mxu0 }
  0xe7   : > { %v442_v20 = vadd.f32 %v793_v19, %v975_v18  ;;  %v809_v21 = vpop.f32.mrb[0].mxu1  ;;  %v433_v22 = vpop.f32.mrb[1].mxu0 }
  0xe8   : > { %v506_v23 = vadd.f32 %v809_v21, %v975_v18  ;;  %v434_v24 = vadd.f32 %v975_v18, %v433_v22  ;;  %v497_v25 = vpop.f32.mrb[1].mxu1  ;;  %v794_v26 = vpop.f32.mrb[2].mxu0 }
  0xe9   : > { %v562_v27 = vmax.f32 %v442_v20, 0.0  ;;  %v498_v28 = vadd.f32 %v975_v18, %v497_v25  ;;  %v445_v29 = vadd.f32 %v794_v26, %v975_v18  ;;  %v810_v30 = vpop.f32.mrb[2].mxu1  ;;  %v436_v31 = vpop.f32.mrb[3].mxu0 }
  0xea   : > { %v578_v32 = vmax.f32 %v506_v23, 0.0  ;;  %v560_v33 = vmax.f32 %v434_v24, 0.0  ;;  %v509_v34 = vadd.f32 %v810_v30, %v975_v18  ;;  %v437_v35 = vadd.f32 %v975_v18, %v436_v31  ;;  %v500_v36 = vpop.f32.mrb[3].mxu1 }
  0xeb   : > { %594 = vst [vmem:[%s982_s28 + $0x10] sm:$0xff] %v562_v27  ;;  %v576_v37 = vmax.f32 %v498_v28, 0.0  ;;  %v563_v38 = vmax.f32 %v445_v29, 0.0  ;;  %v501_v39 = vadd.f32 %v975_v18, %v500_v36 }
  0xec   : > { %610 = vst [vmem:[%s982_s28 + $0x90] sm:$0xff] %v578_v32  ;;  %592 = vst [vmem:[%s982_s28] sm:$0xff] %v560_v33  ;;  %v579_v40 = vmax.f32 %v509_v34, 0.0  ;;  %v561_v41 = vmax.f32 %v437_v35, 0.0 }
  0xed   : > { %608 = vst [vmem:[%s982_s28 + $0x80] sm:$0xff] %v576_v37  ;;  %595 = vst [vmem:[%s982_s28 + $0x18] sm:$0xff] %v563_v38  ;;  %v577_v42 = vmax.f32 %v501_v39, 0.0 }
  0xee   : > { %611 = vst [vmem:[%s982_s28 + $0x98] sm:$0xff] %v579_v40  ;;  %593 = vst [vmem:[%s982_s28 + $0x8] sm:$0xff] %v561_v41  ;;  %v797_v43 = vpop.f32.mrb[4].mxu0 }
  0xef   : > { %609 = vst [vmem:[%s982_s28 + $0x88] sm:$0xff] %v577_v42  ;;  %v458_v44 = vadd.f32 %v797_v43, %v975_v18  ;;  %v813_v45 = vpop.f32.mrb[4].mxu1  ;;  %v449_v46 = vpop.f32.mrb[5].mxu0 }
  0xf0   : > { %v522_v47 = vadd.f32 %v813_v45, %v975_v18  ;;  %v450_v48 = vadd.f32 %v975_v18, %v449_v46  ;;  %v513_v49 = vpop.f32.mrb[5].mxu1  ;;  %v798_v50 = vpop.f32.mrb[6].mxu0 }
  0xf1   : > { %v566_v51 = vmax.f32 %v458_v44, 0.0  ;;  %v514_v52 = vadd.f32 %v975_v18, %v513_v49  ;;  %v461_v53 = vadd.f32 %v798_v50, %v975_v18  ;;  %v814_v54 = vpop.f32.mrb[6].mxu1  ;;  %v452_v55 = vpop.f32.mrb[7].mxu0 }
  0xf2   : > { %v582_v56 = vmax.f32 %v522_v47, 0.0  ;;  %v564_v57 = vmax.f32 %v450_v48, 0.0  ;;  %v525_v58 = vadd.f32 %v814_v54, %v975_v18  ;;  %v453_v59 = vadd.f32 %v975_v18, %v452_v55  ;;  %v516_v60 = vpop.f32.mrb[7].mxu1 }
  0xf3   : > { %598 = vst [vmem:[%s982_s28 + $0x30] sm:$0xff] %v566_v51  ;;  %v580_v61 = vmax.f32 %v514_v52, 0.0  ;;  %v567_v62 = vmax.f32 %v461_v53, 0.0  ;;  %v517_v63 = vadd.f32 %v975_v18, %v516_v60 }
  0xf4   : > { %614 = vst [vmem:[%s982_s28 + $0xb0] sm:$0xff] %v582_v56  ;;  %596 = vst [vmem:[%s982_s28 + $0x20] sm:$0xff] %v564_v57  ;;  %v583_v0 = vmax.f32 %v525_v58, 0.0  ;;  %v565_v1 = vmax.f32 %v453_v59, 0.0 }
  0xf5   : > { %612 = vst [vmem:[%s982_s28 + $0xa0] sm:$0xff] %v580_v61  ;;  %599 = vst [vmem:[%s982_s28 + $0x38] sm:$0xff] %v567_v62  ;;  %v581_v2 = vmax.f32 %v517_v63, 0.0 }
  0xf6   : > { %615 = vst [vmem:[%s982_s28 + $0xb8] sm:$0xff] %v583_v0  ;;  %597 = vst [vmem:[%s982_s28 + $0x28] sm:$0xff] %v565_v1  ;;  %v801_v3 = vpop.f32.mrb[8].mxu0 }
  0xf7   : > { %613 = vst [vmem:[%s982_s28 + $0xa8] sm:$0xff] %v581_v2  ;;  %v474_v4 = vadd.f32 %v801_v3, %v975_v18  ;;  %v817_v5 = vpop.f32.mrb[8].mxu1  ;;  %v465_v6 = vpop.f32.mrb[9].mxu0 }
  0xf8   : > { %v538_v7 = vadd.f32 %v817_v5, %v975_v18  ;;  %v466_v8 = vadd.f32 %v975_v18, %v465_v6  ;;  %v529_v9 = vpop.f32.mrb[9].mxu1  ;;  %v802_v10 = vpop.f32.mrb[10].mxu0 }
  0xf9   : > { %v570_v11 = vmax.f32 %v474_v4, 0.0  ;;  %v530_v12 = vadd.f32 %v975_v18, %v529_v9  ;;  %v477_v13 = vadd.f32 %v802_v10, %v975_v18  ;;  %v818_v14 = vpop.f32.mrb[10].mxu1  ;;  %v468_v15 = vpop.f32.mrb[11].mxu0 }
  0xfa   : > { %v586_v16 = vmax.f32 %v538_v7, 0.0  ;;  %v568_v17 = vmax.f32 %v466_v8, 0.0  ;;  %v541_v19 = vadd.f32 %v818_v14, %v975_v18  ;;  %v469_v20 = vadd.f32 %v975_v18, %v468_v15  ;;  %v532_v21 = vpop.f32.mrb[11].mxu1 }
  0xfb   : > { %602 = vst [vmem:[%s982_s28 + $0x50] sm:$0xff] %v570_v11  ;;  %v584_v22 = vmax.f32 %v530_v12, 0.0  ;;  %v571_v23 = vmax.f32 %v477_v13, 0.0  ;;  %v533_v24 = vadd.f32 %v975_v18, %v532_v21 }
  0xfc   : > { %618 = vst [vmem:[%s982_s28 + $0xd0] sm:$0xff] %v586_v16  ;;  %600 = vst [vmem:[%s982_s28 + $0x40] sm:$0xff] %v568_v17  ;;  %v587_v25 = vmax.f32 %v541_v19, 0.0  ;;  %v569_v26 = vmax.f32 %v469_v20, 0.0 }
  0xfd   : > { %616 = vst [vmem:[%s982_s28 + $0xc0] sm:$0xff] %v584_v22  ;;  %603 = vst [vmem:[%s982_s28 + $0x58] sm:$0xff] %v571_v23  ;;  %v585_v27 = vmax.f32 %v533_v24, 0.0 }
  0xfe   : > { %619 = vst [vmem:[%s982_s28 + $0xd8] sm:$0xff] %v587_v25  ;;  %601 = vst [vmem:[%s982_s28 + $0x48] sm:$0xff] %v569_v26  ;;  %v805_v28 = vpop.f32.mrb[12].mxu0 }
  0xff   : > { %617 = vst [vmem:[%s982_s28 + $0xc8] sm:$0xff] %v585_v27  ;;  %v490_v29 = vadd.f32 %v805_v28, %v975_v18  ;;  %v821_v30 = vpop.f32.mrb[12].mxu1  ;;  %v481_v31 = vpop.f32.mrb[13].mxu0 }
 0x100   : > { %v554_v32 = vadd.f32 %v821_v30, %v975_v18  ;;  %v482_v33 = vadd.f32 %v975_v18, %v481_v31  ;;  %v545_v34 = vpop.f32.mrb[13].mxu1  ;;  %v806_v35 = vpop.f32.mrb[14].mxu0 }
 0x101   : > { %v574_v36 = vmax.f32 %v490_v29, 0.0  ;;  %v546_v37 = vadd.f32 %v975_v18, %v545_v34  ;;  %v493_v38 = vadd.f32 %v806_v35, %v975_v18  ;;  %v822_v39 = vpop.f32.mrb[14].mxu1  ;;  %v484_v40 = vpop.f32.mrb[15].mxu0 }
 0x102   : > { %v590_v41 = vmax.f32 %v554_v32, 0.0  ;;  %v572_v42 = vmax.f32 %v482_v33, 0.0  ;;  %v557_v43 = vadd.f32 %v822_v39, %v975_v18  ;;  %v485_v44 = vadd.f32 %v975_v18, %v484_v40  ;;  %v548_v45 = vpop.f32.mrb[15].mxu1 }
 0x103   : > { %606 = vst [vmem:[%s982_s28 + $0x70] sm:$0xff] %v574_v36  ;;  %v588_v46 = vmax.f32 %v546_v37, 0.0  ;;  %v575_v47 = vmax.f32 %v493_v38, 0.0  ;;  %v549_v48 = vadd.f32 %v975_v18, %v548_v45 }
 0x104   : > { %622 = vst [vmem:[%s982_s28 + $0xf0] sm:$0xff] %v590_v41  ;;  %604 = vst [vmem:[%s982_s28 + $0x60] sm:$0xff] %v572_v42  ;;  %v591_v49 = vmax.f32 %v557_v43, 0.0  ;;  %v573_v50 = vmax.f32 %v485_v44, 0.0 }
 0x105   : > { %620 = vst [vmem:[%s982_s28 + $0xe0] sm:$0xff] %v588_v46  ;;  %607 = vst [vmem:[%s982_s28 + $0x78] sm:$0xff] %v575_v47  ;;  %v589_v51 = vmax.f32 %v549_v48, 0.0 }
 0x106   : > { %623 = vst [vmem:[%s982_s28 + $0xf8] sm:$0xff] %v591_v49  ;;  %605 = vst [vmem:[%s982_s28 + $0x68] sm:$0xff] %v573_v50 }
 0x107   : > { %621 = vst [vmem:[%s982_s28 + $0xe8] sm:$0xff] %v589_v51 }
 0x108 PF: > { %s13_s14 = sadd.s32 1, %s889_s14   ;;  %s1060_s12 = smov %s885_s13 }
 0x109   : > { %p10_p5 = scmp.ge.s32.totalorder %s13_s14, 4   ;;  %s1061_s13 = smov %s1063_s15 }
 0x10b   :  { %12 = sbr.rel (!%p10_p5) target bundleno = 2 (0x2), region = 68 }

// kernel: inception_forward.6
= control target key start
LH: loop header
LB: loop body
LE: loop exit
PB: predicated region body
PF: predicated region fallthrough
CT: control target
= control target key end

     0   :  { %s1199_s18 = smov 0   ;;  %s1201_s19 = smov 0   ;;  %s1352_s0 = inlined_call_operand.vmem [shape: f32[2,18,18,8], index: 0, kind: input, shape index: {}, may-alias: {0,1,2}]   ;;  %s1353_s1 = inlined_call_operand.vmem [shape: f32[2,18,18,8], index: 1, kind: input, shape index: {}, may-alias: {0,1,2}]   ;;  %s1354_s2 = inlined_call_operand.vmem [shape: f32[2,18,18,8], index: 2, kind: input, shape index: {}, may-alias: {0,1,2}]   ;;  %s1355_s3 = inlined_call_operand.vmem [shape: bf16[9,8,16], index: 3, kind: input, shape index: {}]   ;;  %s1356_s4 = inlined_call_operand.vmem [shape: f32[1,16], index: 4, kind: input, shape index: {}]   ;;  %s1357_s5 = inlined_call_operand.vmem [shape: f32[2,16,16,16], index: 5, kind: output, shape index: {}]  }
   0x1   :  { %s1203_s20 = smov 0   ;;  %s1205_s21 = smov 0  }
   0x2   :  { %s1207_s22 = smov 0  }
   0x3 LB: > { %s24_s23 = sadd.s32 1, %s1157_s20  ;;  %s27_s24 = sadd.s32 1, %s1161_s21  ;;  %s1165_s22 = sphi %s1207_s22, %s15_s22   ;;  %s1161_s21 = sphi %s1205_s21, %s1361_s21   ;;  %s1157_s20 = sphi %s1203_s20, %s1360_s20   ;;  %s1153_s19 = sphi %s1201_s19, %s1359_s19   ;;  %s1149_s18 = sphi %s1199_s18, %s1358_s18  }
   0x4   : > { %p25_p0 = scmp.ge.s32.totalorder %s24_s23, 16  ;;  %p982_p1 = scmp.ge.s32.totalorder %s1165_s22, 1 }
   0x5   : > { %p247_p2 = scmp.lt.s32.totalorder %s1165_s22, 33 }
   0x6   : > { %s1363_s23 = smov (%p25_p0, %s24_s23), 0  ;;  %s1365_s24 = smov (!%p25_p0, %s27_s24), %s1161_s21 }
   0x7   : > { %p248_p3 = pnand %p982_p1, %p247_p2  ;;  %p29_p4 = scmp.ge.s32.totalorder %s1365_s24, 2 }
   0x8   : > { %v989_v0 = vld [vmem:[%s1355_s3 + $0x4] sm:$0xf] (!%p248_p3)  ;;  %vm357_vm0 = vcmask (!%p248_p3), 1043456   ;;  %v347_v1 = vld [vmem:[%s1355_s3] sm:$0xf] (!%p248_p3)  ;;  %v1167_v2 = vmov (!%p248_p3), 0.0  }
   0x9   : > { %s1367_s24 = smov (%p29_p4, %s1365_s24), 0  ;;  %251 = sbr.rel (%p248_p3) target bundleno = 280 (0x118), region = 40 }
   0xa   : > { %1027 = vmatprep.subr.bf16.mxu0 (!%p248_p3), %v1167_v2  ;;  %v359_v3 = vsel (!%p248_p3), %vm357_vm0, %v989_v0, 0  ;;  %1033 = vmatprep.subr.bf16.mxu1 (!%p248_p3), %v1167_v2  ;;  %v406_v4 = vsel (!%p248_p3), %vm357_vm0, %v347_v1, 0  ;;  %p303_p5 = scmp.lt.s32.totalorder (!%p248_p3), %s1153_s19, 1  ;;  %p305_p6 = scmp.lt.s32.totalorder (!%p248_p3), %s1149_s18, 17  ;;  %vm1168_vm1 = vmmov (!%p248_p3), 0   ;;  %vm353_vm2 = vcmask (!%p248_p3), 64512  }
   0xb   : > { %1028 = vmatpush3.bf16.msra.mxu0 (!%p248_p3), %v359_v3  ;;  %1034 = vmatpush3.bf16.msra.mxu1 (!%p248_p3), %v406_v4  ;;  %s312_s6 = sadd.s32 (!%p248_p3), 1, %s1149_s18  ;;  %s323_s8 = sadd.s32 (!%p248_p3), 2, %s1149_s18  ;;  %v992_v5 = vld [vmem:[%s1355_s3 + $0x8] sm:$0xf] (!%p248_p3)  ;;  %v994_v6 = vld [vmem:[%s1355_s3 + $0xc] sm:$0xf] (!%p248_p3) }
   0xc   : > { %1029 = vmatprep.mubr.msk.bf16.mxu0 (!%p248_p3), %vm1168_vm1, %v1167_v2  ;;  %1035 = vmatprep.mubr.msk.bf16.mxu1 (!%p248_p3), %vm1168_vm1, %v1167_v2  ;;  %p315_p7 = scmp.lt.s32.totalorder (!%p248_p3), %s312_s6, 17  ;;  %p326_p8 = scmp.lt.s32.totalorder (!%p248_p3), %s323_s8, 17  ;;  %v458_v12 = vsel (!%p248_p3), %vm357_vm0, %v992_v5, 0  ;;  %v512_v14 = vsel (!%p248_p3), %vm357_vm0, %v994_v6, 0  ;;  %v996_v17 = vld [vmem:[%s1355_s3 + $0x10] sm:$0xf] (!%p248_p3) }
   0xd   : > { %1039 = vmatprep.subr.bf16.mxu0 (!%p248_p3), %v1167_v2  ;;  %1045 = vmatprep.subr.bf16.mxu1 (!%p248_p3), %v1167_v2  ;;  %v998_v21 = vld [vmem:[%s1355_s3 + $0x14] sm:$0xf] (!%p248_p3)  ;;  %v566_v23 = vsel (!%p248_p3), %vm357_vm0, %v996_v17, 0  ;;  %v1000_v29 = vld [vmem:[%s1355_s3 + $0x18] sm:$0xf] (!%p248_p3)  ;;  %p336_p9 = scmp.lt.s32.totalorder (!%p248_p3), %s1149_s18, 15 }
   0xe   : > { %v620_v24 = vsel (!%p248_p3), %vm357_vm0, %v998_v21, 0  ;;  %v1002_v31 = vld [vmem:[%s1355_s3 + $0x1c] sm:$0xf] (!%p248_p3)  ;;  %v674_v33 = vsel (!%p248_p3), %vm357_vm0, %v1000_v29, 0  ;;  %v1004_v39 = vld [vmem:[%s1355_s3 + $0x20] sm:$0xf] (!%p248_p3) }
   0xf   : > { %v728_v34 = vsel (!%p248_p3), %vm357_vm0, %v1002_v31, 0  ;;  %v782_v42 = vsel (!%p248_p3), %vm357_vm0, %v1004_v39, 0  ;;  %v1006_v29 = vld [vmem:[%s1356_s4] ss:$0 sm:$0xff] (!%p248_p3)  ;;  %vm838_vm3 = vcmask (!%p248_p3), 130048  }
  0x10   : > { %s1369_s19 = smov (!%p303_p5, %s1153_s19), 1  ;;  %s1371_s6 = smov (!%p315_p7, %s312_s6), 17 }
  0x11   : > { %s306_s29 = scalar_select %p305_p6, %s1149_s18, 17 }
  0x12   : > { %s1256_s30 = smul.u32 54, %s1369_s19  ;;  %s1373_s8 = smov (!%p326_p8, %s323_s8), 17 }
  0x13   : > { %s1081_s7 = smul.u32 3, %s306_s29  ;;  %s1375_s18 = smov (!%p336_p9, %s1149_s18), 15 }
  0x14   : > { %s1083_s25 = smul.u32 3, %s1371_s6  ;;  %s986_s29 = sshll.u32 %s1375_s18, 1 }
  0x15   : > { %s309_s9 = sadd.s32 %s1256_s30, %s1081_s7  ;;  %s1084_s12 = smul.u32 3, %s1373_s8 }
  0x16   : > { %s983_s10 = sshll.u32 %s309_s9, 3  ;;  %s319_s26 = sadd.s32 %s1083_s25, %s1256_s30 }
  0x17   : > { %s311_s15 = scalar_lea.vmem %s1352_s0, %s983_s10  ;;  %s984_s27 = sshll.u32 %s319_s26, 3 }
  0x18   : > { %v348_v7 = vld [vmem:[%s311_s15 + $0x1] sm:$0xff]  ;;  %v349_v8 = vld [vmem:[%s311_s15 + $0x9] sm:$0xff]  ;;  %s321_s9 = scalar_lea.vmem %s1353_s1, %s984_s27  ;;  %s330_s13 = sadd.s32 %s1084_s12, %s1256_s30 }
  0x19   : > { %v344_v9 = vld [vmem:[%s311_s15] sm:$0xff]  ;;  %v350_v10 = vpack.c.bf16 %v349_v8, %v348_v7  ;;  %v345_v11 = vld [vmem:[%s311_s15 + $0x8] sm:$0xff]  ;;  %s985_s30 = sshll.u32 %s330_s13, 3  ;;  %s987_s6 = sshll.u32 %s1369_s19, 5 }
  0x1a   : > { %v346_v13 = vpack.c.bf16 %v345_v11, %v344_v9  ;;  %v449_v15 = vld [vmem:[%s311_s15 + $0x2] sm:$0xff]  ;;  %v450_v16 = vld [vmem:[%s311_s15 + $0xa] sm:$0xff]  ;;  %s332_s26 = scalar_lea.vmem %s1354_s2, %s985_s30  ;;  %s340_s7 = sadd.s32 %s987_s6, %s986_s29 }
  0x1b   : > { %1030 = vmatmul.mubr.msk.bf16.vlgmr.msra.gmra.mrb[0].mxu0 %vm353_vm2, %v350_v10  ;;  %v451_v18 = vpack.c.bf16 %v450_v16, %v449_v15  ;;  %v503_v19 = vld [vmem:[%s321_s9] sm:$0xff]  ;;  %v504_v20 = vld [vmem:[%s321_s9 + $0x8] sm:$0xff]  ;;  %s988_s11 = sshll.u32 %s340_s7, 3 }
  0x1c   : > { %1036 = vmatmul.mubr.msk.bf16.vlgmr.msra.gmra.mrb[0].mxu1 %vm353_vm2, %v346_v13  ;;  %1040 = vmatpush3.bf16.msra.mxu0 %v458_v12  ;;  %v505_v22 = vpack.c.bf16 %v504_v20, %v503_v19  ;;  %v557_v25 = vld [vmem:[%s321_s9 + $0x1] sm:$0xff]  ;;  %v558_v26 = vld [vmem:[%s321_s9 + $0x9] sm:$0xff]  ;;  %s342_s18 = scalar_lea.vmem %s1357_s5, %s988_s11 }
  0x1d   : > { %1046 = vmatpush3.bf16.msra.mxu1 %v512_v14  ;;  %1041 = vmatprep.mubr.msk.bf16.mxu0 %vm1168_vm1, %v1167_v2  ;;  %v611_v27 = vld [vmem:[%s321_s9 + $0x2] sm:$0xff]  ;;  %v612_v28 = vld [vmem:[%s321_s9 + $0xa] sm:$0xff]  ;;  %v559_v30 = vpack.c.bf16 %v558_v26, %v557_v25 }
  0x1e   : > { %1051 = vmatprep.subr.bf16.mxu0 %v1167_v2  ;;  %1047 = vmatprep.mubr.msk.bf16.mxu1 %vm1168_vm1, %v1167_v2  ;;  %v613_v32 = vpack.c.bf16 %v612_v28, %v611_v27  ;;  %v665_v35 = vld [vmem:[%s332_s26] sm:$0xff]  ;;  %v666_v36 = vld [vmem:[%s332_s26 + $0x8] sm:$0xff] }
  0x1f   : > { %1057 = vmatprep.subr.bf16.mxu1 %v1167_v2  ;;  %v719_v37 = vld [vmem:[%s332_s26 + $0x1] sm:$0xff]  ;;  %v720_v38 = vld [vmem:[%s332_s26 + $0x9] sm:$0xff]  ;;  %v667_v40 = vpack.c.bf16 %v666_v36, %v665_v35 }
  0x20   : > { %v721_v41 = vpack.c.bf16 %v720_v38, %v719_v37  ;;  %v773_v43 = vld [vmem:[%s332_s26 + $0x2] sm:$0xff]  ;;  %v774_v44 = vld [vmem:[%s332_s26 + $0xa] sm:$0xff] }
  0x21   : > { %v775_v45 = vpack.c.bf16 %v774_v44, %v773_v43 }
  0x23   : > { %1042 = vmatmul.mubr.msk.bf16.vlgmr.msra.gmra.mrb[4].mxu0 %vm353_vm2, %v451_v18 }
  0x24   : > { %1052 = vmatpush3.bf16.msra.mxu0 %v566_v23  ;;  %1048 = vmatmul.mubr.msk.bf16.vlgmr.msra.gmra.mrb[4].mxu1 %vm353_vm2, %v505_v22 }
  0x25   : > { %1058 = vmatpush3.bf16.msra.mxu1 %v620_v24  ;;  %1053 = vmatprep.mubr.msk.bf16.mxu0 %vm1168_vm1, %v1167_v2 }
  0x26   : > { %1063 = vmatprep.subr.bf16.mxu0 %v1167_v2  ;;  %1059 = vmatprep.mubr.msk.bf16.mxu1 %vm1168_vm1, %v1167_v2 }
  0x27   : > { %1069 = vmatprep.subr.bf16.mxu1 %v1167_v2 }
  0x2b   : > { %1054 = vmatmul.mubr.msk.bf16.vlgmr.msra.gmra.mrb[8].mxu0 %vm353_vm2, %v559_v30 }
  0x2c   : > { %1064 = vmatpush3.bf16.msra.mxu0 %v674_v33  ;;  %1060 = vmatmul.mubr.msk.bf16.vlgmr.msra.gmra.mrb[8].mxu1 %vm353_vm2, %v613_v32 }
  0x2d   : > { %1070 = vmatpush3.bf16.msra.mxu1 %v728_v34  ;;  %1065 = vmatprep.mubr.msk.bf16.mxu0 %vm1168_vm1, %v1167_v2 }
  0x2e   : > { %1075 = vmatprep.subr.bf16.mxu0 %v1167_v2  ;;  %1071 = vmatprep.mubr.msk.bf16.mxu1 %vm1168_vm1, %v1167_v2 }
  0x33   : > { %1066 = vmatmul.mubr.msk.bf16.vlgmr.msra.gmra.mrb[12].mxu0 %vm353_vm2, %v667_v40 }
  0x34   : > { %1076 = vmatpush3.bf16.msra.mxu0 %v782_v42  ;;  %1072 = vmatmul.mubr.msk.bf16.vlgmr.msra.gmra.mrb[12].mxu1 %vm353_vm2, %v721_v41 }
  0x35   : > { %1077 = vmatprep.mubr.msk.bf16.mxu0 %vm1168_vm1, %v1167_v2 }
  0x3b   : > { %1078 = vmatmul.mubr.msk.bf16.vlgmr.msra.gmra.mrb[16].mxu0 %vm353_vm2, %v775_v45 }
  0xee   : > { %v395_v46 = vpop.f32.mrb[0].mxu0 }
  0xef   : > { %v442_v47 = vpop.f32.mrb[0].mxu1  ;;  %v1031_v48 = vpop.f32.mrb[1].mxu0 }
  0xf0   : > { %v443_v49 = vadd.f32 %v442_v47, %v395_v46  ;;  %v1037_v50 = vpop.f32.mrb[1].mxu1  ;;  %v398_v51 = vpop.f32.mrb[2].mxu0 }
  0xf1   : > { %v445_v52 = vpop.f32.mrb[2].mxu1  ;;  %v1032_v53 = vpop.f32.mrb[3].mxu0 }
  0xf2   : > { %v446_v54 = vadd.f32 %v445_v52, %v398_v51  ;;  %v1038_v55 = vpop.f32.mrb[3].mxu1 }
  0xf6   : > { %v494_v56 = vpop.f32.mrb[4].mxu0 }
  0xf7   : > { %v501_v57 = vadd.f32 %v494_v56, %v443_v49  ;;  %v1043_v58 = vpop.f32.mrb[5].mxu0  ;;  %v548_v59 = vpop.f32.mrb[4].mxu1 }
  0xf8   : > { %v497_v60 = vpop.f32.mrb[6].mxu0  ;;  %v1049_v61 = vpop.f32.mrb[5].mxu1 }
  0xf9   : > { %v502_v62 = vadd.f32 %v497_v60, %v446_v54  ;;  %v555_v63 = vadd.f32 %v548_v59, %v501_v57  ;;  %v1044_v0 = vpop.f32.mrb[7].mxu0  ;;  %v551_v1 = vpop.f32.mrb[6].mxu1 }
  0xfa   : > { %v1050_v2 = vpop.f32.mrb[7].mxu1 }
  0xfb   : > { %v556_v3 = vadd.f32 %v551_v1, %v502_v62 }
  0xfe   : > { %v602_v4 = vpop.f32.mrb[8].mxu0 }
  0xff   : > { %v609_v5 = vadd.f32 %v602_v4, %v555_v63  ;;  %v1055_v6 = vpop.f32.mrb[9].mxu0  ;;  %v656_v7 = vpop.f32.mrb[8].mxu1 }
 0x100   : > { %v605_v8 = vpop.f32.mrb[10].mxu0  ;;  %v1061_v9 = vpop.f32.mrb[9].mxu1 }
 0x101   : > { %v610_v10 = vadd.f32 %v605_v8, %v556_v3  ;;  %v663_v11 = vadd.f32 %v656_v7, %v609_v5  ;;  %v1056_v12 = vpop.f32.mrb[11].mxu0  ;;  %v659_v13 = vpop.f32.mrb[10].mxu1 }
 0x102   : > { %v1062_v14 = vpop.f32.mrb[11].mxu1 }
 0x103   : > { %v664_v15 = vadd.f32 %v659_v13, %v610_v10 }
 0x106   : > { %v710_v16 = vpop.f32.mrb[12].mxu0 }
 0x107   : > { %v717_v17 = vadd.f32 %v710_v16, %v663_v11  ;;  %v1067_v18 = vpop.f32.mrb[13].mxu0  ;;  %v764_v19 = vpop.f32.mrb[12].mxu1 }
 0x108   : > { %v713_v20 = vpop.f32.mrb[14].mxu0  ;;  %v1073_v21 = vpop.f32.mrb[13].mxu1 }
 0x109   : > { %v718_v22 = vadd.f32 %v713_v20, %v664_v15  ;;  %v771_v23 = vadd.f32 %v764_v19, %v717_v17  ;;  %v1068_v24 = vpop.f32.mrb[15].mxu0  ;;  %v767_v25 = vpop.f32.mrb[14].mxu1 }
 0x10a   : > { %v1074_v26 = vpop.f32.mrb[15].mxu1 }
 0x10b   : > { %v772_v27 = vadd.f32 %v767_v25, %v718_v22 }
 0x10e   : > { %v818_v28 = vpop.f32.mrb[16].mxu0 }
 0x10f   : > { %v825_v30 = vadd.f32 %v818_v28, %v771_v23  ;;  %v1079_v31 = vpop.f32.mrb[17].mxu0 }
 0x110   : > { %v821_v32 = vpop.f32.mrb[18].mxu0 }
 0x111   : > { %v834_v33 = vadd.f32 %v1006_v29, %v825_v30  ;;  %v826_v34 = vadd.f32 %v821_v32, %v772_v27  ;;  %v1080_v35 = vpop.f32.mrb[19].mxu0 }
 0x113   : > { %v836_v36 = vmax.f32 %v834_v33, 0.0  ;;  %v835_v37 = vadd.f32 %v1006_v29, %v826_v34 }
 0x115   : > { %839 = vst.msk [vmem:[%s342_s18] sm:$0xff] %vm838_vm3, %v836_v36  ;;  %v837_v38 = vmax.f32 %v835_v37, 0.0 }
 0x117   : > { %840 = vst.msk [vmem:[%s342_s18 + $0x8] sm:$0xff] %vm838_vm3, %v837_v38 }
 0x118 PF: > { %s15_s22 = sadd.s32 1, %s1165_s22   ;;  %s1358_s18 = smov %s1157_s20 }
 0x119   : > { %p12_p10 = scmp.ge.s32.totalorder %s15_s22, 34   ;;  %s1359_s19 = smov %s1161_s21 }
 0x11a   : > { %s1360_s20 = smov %s1363_s23  ;;  %s1361_s21 = smov %s1367_s24 }
 0x11b   :  { %14 = sbr.rel (!%p12_p10) target bundleno = 3 (0x3), region = 84 }

// kernel: inception_forward.8
= control target key start
LH: loop header
LB: loop body
LE: loop exit
PB: predicated region body
PF: predicated region fallthrough
CT: control target
= control target key end

     0   :  { %s583_s12 = smov 0   ;;  %s585_s13 = smov 0   ;;  %s654_s0 = inlined_call_operand.vmem [shape: f32[2,16,16,4], index: 0, kind: input, shape index: {}, may-alias: {0,1,2}]   ;;  %s655_s1 = inlined_call_operand.vmem [shape: f32[2,16,16,4], index: 1, kind: input, shape index: {}, may-alias: {0,1,2}]   ;;  %s656_s2 = inlined_call_operand.vmem [shape: f32[2,16,16,4], index: 2, kind: input, shape index: {}, may-alias: {0,1,2}]   ;;  %s657_s3 = inlined_call_operand.vmem [shape: f32[2,14,14,4], index: 3, kind: output, shape index: {}]  }
   0x1   :  { %s587_s14 = smov 0   ;;  %s589_s15 = smov 0  }
   0x2   :  { %s591_s16 = smov 0  }
   0x3 LB: > { %s22_s17 = sadd.s32 1, %s553_s14  ;;  %s25_s18 = sadd.s32 1, %s557_s15  ;;  %s561_s16 = sphi %s591_s16, %s13_s16   ;;  %s557_s15 = sphi %s589_s15, %s661_s15   ;;  %s553_s14 = sphi %s587_s14, %s660_s14   ;;  %s549_s13 = sphi %s585_s13, %s659_s13   ;;  %s545_s12 = sphi %s583_s12, %s658_s12  }
   0x4   : > { %p23_p0 = scmp.ge.s32.totalorder %s22_s17, 14  ;;  %p468_p1 = scmp.ge.s32.totalorder %s561_s16, 1 }
   0x5   : > { %p197_p2 = scmp.lt.s32.totalorder %s561_s16, 29 }
   0x6   : > { %s663_s17 = smov (%p23_p0, %s22_s17), 0  ;;  %s665_s18 = smov (!%p23_p0, %s25_s18), %s557_s15 }
   0x7   : > { %p198_p3 = pnand %p468_p1, %p197_p2  ;;  %p27_p4 = scmp.ge.s32.totalorder %s665_s18, 2 }
   0x8   : > { %p249_p5 = scmp.lt.s32.totalorder (!%p198_p3), %s549_s13, 1  ;;  %p251_p6 = scmp.lt.s32.totalorder (!%p198_p3), %s545_s12, 15  ;;  %vm323_vm0 = vcmask (!%p198_p3), 31744   ;;  %vm325_vm1 = vcmask (!%p198_p3), 29696  }
   0x9   : > { %s667_s18 = smov (%p27_p4, %s665_s18), 0  ;;  %201 = sbr.rel (%p198_p3) target bundleno = 43 (0x2b), region = 32 }
   0xa   : > { %s258_s19 = sadd.s32 (!%p198_p3), 1, %s545_s12  ;;  %s269_s20 = sadd.s32 (!%p198_p3), 2, %s545_s12 }
   0xb   : > { %p261_p7 = scmp.lt.s32.totalorder (!%p198_p3), %s258_s19, 15  ;;  %p272_p8 = scmp.lt.s32.totalorder (!%p198_p3), %s269_s20, 15 }
   0xc   : > { %p282_p9 = scmp.lt.s32.totalorder (!%p198_p3), %s545_s12, 13 }
  0x10   : > { %s669_s13 = smov (!%p249_p5, %s549_s13), 1  ;;  %s671_s19 = smov (!%p261_p7, %s258_s19), 15 }
  0x11   : > { %s252_s21 = scalar_select %p251_p6, %s545_s12, 15 }
  0x12   : > { %s470_s22 = sshll.u32 %s669_s13, 5  ;;  %s673_s20 = smov (!%p272_p8, %s269_s20), 15 }
  0x13   : > { %s469_s23 = sshll.u32 %s252_s21, 1  ;;  %s472_s29 = sshll.u32 %s671_s19, 1 }
  0x14   : > { %s255_s24 = sadd.s32 %s470_s22, %s469_s23  ;;  %s265_s30 = sadd.s32 %s472_s29, %s470_s22 }
  0x15   : > { %s471_s25 = sshll.u32 %s255_s24, 3  ;;  %s475_s4 = sshll.u32 %s673_s20, 1 }
  0x16   : > { %s257_s28 = scalar_lea.vmem %s654_s0, %s471_s25  ;;  %s474_s5 = sshll.u32 %s265_s30, 3 }
  0x17   : > { %v289_v0 = vld [vmem:[%s257_s28] sm:$0xff]  ;;  %v290_v4 = vld [vmem:[%s257_s28 + $0x8] sm:$0x3f]  ;;  %s276_s6 = sadd.s32 %s475_s4, %s470_s22  ;;  %s267_s9 = scalar_lea.vmem %s655_s1, %s474_s5 }
  0x18   : > { %v291_v1 = vld [vmem:[%s257_s28 + $0x1] sm:$0xff]  ;;  %v292_v5 = vld [vmem:[%s257_s28 + $0x9] sm:$0x3f]  ;;  %s477_s10 = sshll.u32 %s276_s6, 3  ;;  %s482_s23 = smul.u32 28, %s669_s13 }
  0x19   : > { %v295_v2 = vld [vmem:[%s257_s28 + $0x2] sm:$0xff]  ;;  %v293_v3 = vmax.f32 %v289_v0, %v291_v1  ;;  %v294_v6 = vmax.f32 %v290_v4, %v292_v5  ;;  %v296_v7 = vld [vmem:[%s257_s28 + $0xa] sm:$0x3f]  ;;  %s278_s19 = scalar_lea.vmem %s656_s2, %s477_s10  ;;  %s675_s12 = smov (!%p282_p9, %s545_s12), 13 }
  0x1a   : > { %v299_v10 = vld [vmem:[%s267_s9] sm:$0xff]  ;;  %v300_v14 = vld [vmem:[%s267_s9 + $0x8] sm:$0x3f]  ;;  %s478_s20 = sshll.u32 %s675_s12, 1 }
  0x1b   : > { %v297_v8 = vmax.f32 %v293_v3, %v295_v2  ;;  %v298_v9 = vmax.f32 %v294_v6, %v296_v7  ;;  %v303_v11 = vld [vmem:[%s267_s9 + $0x1] sm:$0xff]  ;;  %v304_v15 = vld [vmem:[%s267_s9 + $0x9] sm:$0x3f]  ;;  %s286_s22 = sadd.s32 %s482_s23, %s478_s20 }
  0x1c   : > { %v307_v13 = vld [vmem:[%s267_s9 + $0x2] sm:$0xff]  ;;  %v308_v19 = vld [vmem:[%s267_s9 + $0xa] sm:$0x3f]  ;;  %s479_s24 = sshll.u32 %s286_s22, 3 }
  0x1d   : > { %v301_v12 = vmax.f32 %v297_v8, %v299_v10  ;;  %v302_v17 = vmax.f32 %v298_v9, %v300_v14  ;;  %v311_v18 = vld [vmem:[%s278_s19] sm:$0xff]  ;;  %v312_v23 = vld [vmem:[%s278_s19 + $0x8] sm:$0x3f]  ;;  %s288_s12 = scalar_lea.vmem %s657_s3, %s479_s24 }
  0x1e   : > { %v315_v22 = vld [vmem:[%s278_s19 + $0x1] sm:$0xff]  ;;  %v316_v27 = vld [vmem:[%s278_s19 + $0x9] sm:$0x3f] }
  0x1f   : > { %v305_v16 = vmax.f32 %v301_v12, %v303_v11  ;;  %v306_v21 = vmax.f32 %v302_v17, %v304_v15  ;;  %v319_v26 = vld [vmem:[%s278_s19 + $0x2] sm:$0xff]  ;;  %v320_v30 = vld [vmem:[%s278_s19 + $0xa] sm:$0x3f] }
  0x21   : > { %v309_v20 = vmax.f32 %v305_v16, %v307_v13  ;;  %v310_v25 = vmax.f32 %v306_v21, %v308_v19 }
  0x23   : > { %v313_v24 = vmax.f32 %v309_v20, %v311_v18  ;;  %v314_v29 = vmax.f32 %v310_v25, %v312_v23 }
  0x25   : > { %v317_v28 = vmax.f32 %v313_v24, %v315_v22  ;;  %v318_v32 = vmax.f32 %v314_v29, %v316_v27 }
  0x27   : > { %v321_v31 = vmax.f32 %v317_v28, %v319_v26  ;;  %v322_v33 = vmax.f32 %v318_v32, %v320_v30 }
  0x29   : > { %324 = vst.msk [vmem:[%s288_s12] sm:$0xff] %vm323_vm0, %v321_v31 }
  0x2a   : > { %326 = vst.msk [vmem:[%s288_s12 + $0x8] sm:$0x3f] %vm325_vm1, %v322_v33 }
  0x2b PF: > { %s13_s16 = sadd.s32 1, %s561_s16   ;;  %s658_s12 = smov %s553_s14 }
  0x2c   : > { %p10_p10 = scmp.ge.s32.totalorder %s13_s16, 30   ;;  %s659_s13 = smov %s557_s15 }
  0x2d   : > { %s660_s14 = smov %s663_s17  ;;  %s661_s15 = smov %s667_s18 }
  0x2e   :  { %12 = sbr.rel (!%p10_p10) target bundleno = 3 (0x3), region = 68 }

// kernel: inception_forward.7
= control target key start
LH: loop header
LB: loop body
LE: loop exit
PB: predicated region body
PF: predicated region fallthrough
CT: control target
= control target key end

     0   :  { %s2415_s24 = smov 0   ;;  %s2417_s25 = smov 0   ;;  %s2766_s0 = inlined_call_operand.vmem [shape: f32[2,20,20,4], index: 0, kind: input, shape index: {}, may-alias: {0,1,2,3,4}]   ;;  %s2767_s1 = inlined_call_operand.vmem [shape: f32[2,20,20,4], index: 1, kind: input, shape index: {}, may-alias: {0,1,2,3,4}]   ;;  %s2768_s2 = inlined_call_operand.vmem [shape: f32[2,20,20,4], index: 2, kind: input, shape index: {}, may-alias: {0,1,2,3,4}]   ;;  %s2769_s3 = inlined_call_operand.vmem [shape: f32[2,20,20,4], index: 3, kind: input, shape index: {}, may-alias: {0,1,2,3,4}]   ;;  %s2770_s4 = inlined_call_operand.vmem [shape: f32[2,20,20,4], index: 4, kind: input, shape index: {}, may-alias: {0,1,2,3,4}]   ;;  %s2771_s5 = inlined_call_operand.vmem [shape: bf16[25,4,8], index: 5, kind: input, shape index: {}]   ;;  %s2772_s6 = inlined_call_operand.vmem [shape: f32[1,8], index: 6, kind: input, shape index: {}]   ;;  %s2773_s7 = inlined_call_operand.vmem [shape: f32[2,16,16,8], index: 7, kind: output, shape index: {}]  }
   0x1   :  { %s2419_s26 = smov 0   ;;  %s2421_s27 = smov 0  }
   0x2   :  { %s2423_s28 = smov 0  }
   0x3 LB: > { %s26_s29 = sadd.s32 1, %s2363_s26  ;;  %s29_s30 = sadd.s32 1, %s2367_s27  ;;  %s2371_s28 = sphi %s2423_s28, %s17_s28   ;;  %s2367_s27 = sphi %s2421_s27, %s2777_s27   ;;  %s2363_s26 = sphi %s2419_s26, %s2776_s26   ;;  %s2359_s25 = sphi %s2417_s25, %s2775_s25   ;;  %s2355_s24 = sphi %s2415_s24, %s2774_s24  }
   0x4   : > { %p27_p0 = scmp.ge.s32.totalorder %s26_s29, 16  ;;  %p2024_p1 = scmp.ge.s32.totalorder %s2371_s28, 1 }
   0x5   : > { %p337_p2 = scmp.lt.s32.totalorder %s2371_s28, 33 }
   0x6   : > { %s2779_s29 = smov (%p27_p0, %s26_s29), 0  ;;  %s2781_s30 = smov (!%p27_p0, %s29_s30), %s2367_s27 }
   0x7   : > { %p338_p3 = pnand %p2024_p1, %p337_p2  ;;  %p31_p4 = scmp.ge.s32.totalorder %s2781_s30, 2 }
   0x8   : > { %v2033_v0 = vld [vmem:[%s2771_s5 + $0x2] sm:$0x3] (!%p338_p3)  ;;  %vm493_vm0 = vcmask (!%p338_p3), 1041408   ;;  %v483_v1 = vld [vmem:[%s2771_s5] sm:$0x3] (!%p338_p3)  ;;  %v2373_v2 = vmov (!%p338_p3), 0.0  }
   0x9   : > { %s2783_s30 = smov (%p31_p4, %s2781_s30), 0  ;;  %341 = sbr.rel (%p338_p3) target bundleno = 344 (0x158), region = 48 }
   0xa   : > { %2135 = vmatprep.subr.bf16.mxu0 (!%p338_p3), %v2373_v2  ;;  %v495_v3 = vsel (!%p338_p3), %vm493_vm0, %v2033_v0, 0  ;;  %2141 = vmatprep.subr.bf16.mxu1 (!%p338_p3), %v2373_v2  ;;  %v542_v4 = vsel (!%p338_p3), %vm493_vm0, %v483_v1, 0  ;;  %p417_p5 = scmp.lt.s32.totalorder (!%p338_p3), %s2359_s25, 1  ;;  %p419_p6 = scmp.lt.s32.totalorder (!%p338_p3), %s2355_s24, 19  ;;  %vm2374_vm1 = vmmov (!%p338_p3), 0   ;;  %vm489_vm2 = vcmask (!%p338_p3), 31744  }
   0xb   : > { %2136 = vmatpush3.bf16.msra.mxu0 (!%p338_p3), %v495_v3  ;;  %2142 = vmatpush3.bf16.msra.mxu1 (!%p338_p3), %v542_v4  ;;  %s426_s14 = sadd.s32 (!%p338_p3), 1, %s2355_s24  ;;  %v2036_v5 = vld [vmem:[%s2771_s5 + $0x4] sm:$0x3] (!%p338_p3)  ;;  %v2038_v6 = vld [vmem:[%s2771_s5 + $0x6] sm:$0x3] (!%p338_p3)  ;;  %s437_s20 = sadd.s32 (!%p338_p3), 2, %s2355_s24 }
   0xc   : > { %2137 = vmatprep.mubr.msk.bf16.mxu0 (!%p338_p3), %vm2374_vm1, %v2373_v2  ;;  %2143 = vmatprep.mubr.msk.bf16.mxu1 (!%p338_p3), %vm2374_vm1, %v2373_v2  ;;  %p429_p7 = scmp.lt.s32.totalorder (!%p338_p3), %s426_s14, 19  ;;  %v594_v12 = vsel (!%p338_p3), %vm493_vm0, %v2036_v5, 0  ;;  %v648_v14 = vsel (!%p338_p3), %vm493_vm0, %v2038_v6, 0  ;;  %v2040_v19 = vld [vmem:[%s2771_s5 + $0x8] sm:$0x3] (!%p338_p3)  ;;  %p440_p8 = scmp.lt.s32.totalorder (!%p338_p3), %s437_s20, 19 }
   0xd   : > { %2147 = vmatprep.subr.bf16.mxu0 (!%p338_p3), %v2373_v2  ;;  %2153 = vmatprep.subr.bf16.mxu1 (!%p338_p3), %v2373_v2  ;;  %v2042_v21 = vld [vmem:[%s2771_s5 + $0xa] sm:$0x3] (!%p338_p3)  ;;  %v702_v23 = vsel (!%p338_p3), %vm493_vm0, %v2040_v19, 0  ;;  %v2044_v29 = vld [vmem:[%s2771_s5 + $0xc] sm:$0x3] (!%p338_p3)  ;;  %p472_p11 = scmp.lt.s32.totalorder (!%p338_p3), %s2355_s24, 15 }
   0xe   : > { %v756_v24 = vsel (!%p338_p3), %vm493_vm0, %v2042_v21, 0  ;;  %v2046_v31 = vld [vmem:[%s2771_s5 + $0xe] sm:$0x3] (!%p338_p3)  ;;  %v810_v33 = vsel (!%p338_p3), %vm493_vm0, %v2044_v29, 0  ;;  %v2048_v39 = vld [vmem:[%s2771_s5 + $0x10] sm:$0x3] (!%p338_p3) }
   0xf   : > { %v864_v34 = vsel (!%p338_p3), %vm493_vm0, %v2046_v31, 0  ;;  %v2050_v41 = vld [vmem:[%s2771_s5 + $0x12] sm:$0x3] (!%p338_p3)  ;;  %v918_v43 = vsel (!%p338_p3), %vm493_vm0, %v2048_v39, 0  ;;  %v2052_v49 = vld [vmem:[%s2771_s5 + $0x14] sm:$0x3] (!%p338_p3) }
  0x10   : > { %s2785_s25 = smov (!%p417_p5, %s2359_s25), 1  ;;  %s2787_s14 = smov (!%p429_p7, %s426_s14), 19  ;;  %v972_v44 = vsel %vm493_vm0, %v2050_v41, 0  ;;  %v2054_v51 = vld [vmem:[%s2771_s5 + $0x16] sm:$0x3]  ;;  %v1026_v53 = vsel %vm493_vm0, %v2052_v49, 0 }
  0x11   : > { %s420_s12 = scalar_select %p419_p6, %s2355_s24, 19  ;;  %v1080_v54 = vsel %vm493_vm0, %v2054_v51, 0  ;;  %v2056_v59 = vld [vmem:[%s2771_s5 + $0x18] sm:$0x3]  ;;  %v2058_v61 = vld [vmem:[%s2771_s5 + $0x1a] sm:$0x3] }
  0x12   : > { %s2472_s13 = smul.u32 60, %s2785_s25  ;;  %s2789_s20 = smov (!%p440_p8, %s437_s20), 19  ;;  %v1134_v63 = vsel %vm493_vm0, %v2056_v59, 0  ;;  %v1188_v0 = vsel %vm493_vm0, %v2058_v61, 0  ;;  %v2060_v6 = vld [vmem:[%s2771_s5 + $0x1c] sm:$0x3] }
  0x13   : > { %s2285_s15 = smul.u32 3, %s420_s12  ;;  %vm1838_vm3 = vcmask 64512  }
  0x14   : > { %s2287_s9 = smul.u32 3, %s2787_s14 }
  0x15   : > { %s423_s16 = sadd.s32 %s2472_s13, %s2285_s15  ;;  %s2288_s14 = smul.u32 3, %s2789_s20 }
  0x16   : > { %s2025_s17 = sshll.u32 %s423_s16, 3  ;;  %s433_s10 = sadd.s32 %s2287_s9, %s2472_s13 }
  0x17   : > { %s2482_s22 = scalar_lea.vmem %s2766_s0, %s2025_s17  ;;  %s2026_s16 = sshll.u32 %s433_s10, 3 }
  0x18   : > { %v484_v7 = vld [vmem:[%s2482_s22 + $0x1] sm:$0xff]  ;;  %v485_v8 = vld [vmem:[%s2482_s22 + $0x9] sm:$0xff]  ;;  %s2517_s19 = scalar_lea.vmem %s2767_s1, %s2026_s16  ;;  %s444_s15 = sadd.s32 %s2288_s14, %s2472_s13 }
  0x19   : > { %v480_v9 = vld [vmem:[%s2482_s22] sm:$0xff]  ;;  %v486_v10 = vpack.c.bf16 %v485_v8, %v484_v7  ;;  %v481_v11 = vld [vmem:[%s2482_s22 + $0x8] sm:$0xff]  ;;  %s448_s16 = sadd.s32 3, %s2355_s24  ;;  %s2027_s20 = sshll.u32 %s444_s15, 3  ;;  %v2062_v8 = vld [vmem:[%s2771_s5 + $0x1e] sm:$0x3] }
  0x1a   : > { %v482_v13 = vpack.c.bf16 %v481_v11, %v480_v9  ;;  %v585_v15 = vld [vmem:[%s2482_s22 + $0x2] sm:$0xff]  ;;  %v586_v16 = vld [vmem:[%s2482_s22 + $0xa] sm:$0xff]  ;;  %p451_p9 = scmp.lt.s32.totalorder %s448_s16, 19  ;;  %s2584_s8 = scalar_lea.vmem %s2768_s2, %s2027_s20  ;;  %v1296_v11 = vsel %vm493_vm0, %v2062_v8, 0 }
  0x1b   : > { %2138 = vmatmul.mubr.msk.bf16.vlgmr.msra.gmra.mrb[0].mxu0 %vm489_vm2, %v486_v10  ;;  %v639_v17 = vld [vmem:[%s2482_s22 + $0x3] sm:$0xff]  ;;  %v640_v18 = vld [vmem:[%s2482_s22 + $0xb] sm:$0xff]  ;;  %v587_v20 = vpack.c.bf16 %v586_v16, %v585_v15  ;;  %v1242_v10 = vsel %vm493_vm0, %v2060_v6, 0  ;;  %s459_s9 = sadd.s32 4, %s2355_s24  ;;  %v2064_v16 = vld [vmem:[%s2771_s5 + $0x20] sm:$0x3] }
  0x1c   : > { %2144 = vmatmul.mubr.msk.bf16.vlgmr.msra.gmra.mrb[0].mxu1 %vm489_vm2, %v482_v13  ;;  %2148 = vmatpush3.bf16.msra.mxu0 %v594_v12  ;;  %v641_v22 = vpack.c.bf16 %v640_v18, %v639_v17  ;;  %v693_v25 = vld [vmem:[%s2482_s22 + $0x4] sm:$0xff]  ;;  %v694_v26 = vld [vmem:[%s2482_s22 + $0xc] sm:$0xff]  ;;  %s2791_s16 = smov (!%p451_p9, %s448_s16), 19  ;;  %v2066_v18 = vld [vmem:[%s2771_s5 + $0x22] sm:$0x3]  ;;  %p462_p10 = scmp.lt.s32.totalorder %s459_s9, 19 }
  0x1d   : > { %2154 = vmatpush3.bf16.msra.mxu1 %v648_v14  ;;  %2149 = vmatprep.mubr.msk.bf16.mxu0 %vm2374_vm1, %v2373_v2  ;;  %v747_v27 = vld [vmem:[%s2517_s19] sm:$0xff]  ;;  %v748_v28 = vld [vmem:[%s2517_s19 + $0x8] sm:$0xff]  ;;  %v695_v30 = vpack.c.bf16 %v694_v26, %v693_v25  ;;  %s2289_s14 = smul.u32 3, %s2791_s16  ;;  %v1404_v21 = vsel %vm493_vm0, %v2066_v18, 0  ;;  %s2795_s24 = smov (!%p472_p11, %s2355_s24), 15 }
  0x1e   : > { %2159 = vmatprep.subr.bf16.mxu0 %v2373_v2  ;;  %2155 = vmatprep.mubr.msk.bf16.mxu1 %vm2374_vm1, %v2373_v2  ;;  %v749_v32 = vpack.c.bf16 %v748_v28, %v747_v27  ;;  %v801_v35 = vld [vmem:[%s2517_s19 + $0x1] sm:$0xff]  ;;  %v802_v36 = vld [vmem:[%s2517_s19 + $0x9] sm:$0xff]  ;;  %s2793_s9 = smov (!%p462_p10, %s459_s9), 19 }
  0x1f   : > { %2165 = vmatprep.subr.bf16.mxu1 %v2373_v2  ;;  %v855_v37 = vld [vmem:[%s2517_s19 + $0x2] sm:$0xff]  ;;  %v856_v38 = vld [vmem:[%s2517_s19 + $0xa] sm:$0xff]  ;;  %v803_v40 = vpack.c.bf16 %v802_v36, %v801_v35  ;;  %s455_s15 = sadd.s32 %s2289_s14, %s2472_s13  ;;  %s2290_s18 = smul.u32 3, %s2793_s9 }
  0x20   : > { %v857_v42 = vpack.c.bf16 %v856_v38, %v855_v37  ;;  %v909_v45 = vld [vmem:[%s2517_s19 + $0x3] sm:$0xff]  ;;  %v910_v46 = vld [vmem:[%s2517_s19 + $0xb] sm:$0xff]  ;;  %s2028_s21 = sshll.u32 %s455_s15, 3 }
  0x21   : > { %v963_v47 = vld [vmem:[%s2517_s19 + $0x4] sm:$0xff]  ;;  %v964_v48 = vld [vmem:[%s2517_s19 + $0xc] sm:$0xff]  ;;  %v911_v50 = vpack.c.bf16 %v910_v46, %v909_v45  ;;  %s2631_s22 = scalar_lea.vmem %s2769_s3, %s2028_s21  ;;  %s466_s20 = sadd.s32 %s2290_s18, %s2472_s13 }
  0x22   : > { %v965_v52 = vpack.c.bf16 %v964_v48, %v963_v47  ;;  %v1017_v55 = vld [vmem:[%s2584_s8] sm:$0xff]  ;;  %v1018_v56 = vld [vmem:[%s2584_s8 + $0x8] sm:$0xff]  ;;  %s2029_s13 = sshll.u32 %s466_s20, 3  ;;  %s2030_s18 = sshll.u32 %s2795_s24, 1 }
  0x23   : > { %2150 = vmatmul.mubr.msk.bf16.vlgmr.msra.gmra.mrb[4].mxu0 %vm489_vm2, %v587_v20  ;;  %v1071_v57 = vld [vmem:[%s2584_s8 + $0x1] sm:$0xff]  ;;  %v1072_v58 = vld [vmem:[%s2584_s8 + $0x9] sm:$0xff]  ;;  %v1019_v60 = vpack.c.bf16 %v1018_v56, %v1017_v55  ;;  %v1350_v20 = vsel %vm493_vm0, %v2064_v16, 0  ;;  %s2697_s11 = scalar_lea.vmem %s2770_s4, %s2029_s13  ;;  %s2031_s20 = sshll.u32 %s2785_s25, 5 }
  0x24   : > { %2160 = vmatpush3.bf16.msra.mxu0 %v702_v23  ;;  %2156 = vmatmul.mubr.msk.bf16.vlgmr.msra.gmra.mrb[4].mxu1 %vm489_vm2, %v641_v22  ;;  %v1073_v62 = vpack.c.bf16 %v1072_v58, %v1071_v57  ;;  %v1125_v1 = vld [vmem:[%s2584_s8 + $0x2] sm:$0xff]  ;;  %v1126_v3 = vld [vmem:[%s2584_s8 + $0xa] sm:$0xff]  ;;  %s476_s21 = sadd.s32 %s2031_s20, %s2030_s18 }
  0x25   : > { %2166 = vmatpush3.bf16.msra.mxu1 %v756_v24  ;;  %2161 = vmatprep.mubr.msk.bf16.mxu0 %vm2374_vm1, %v2373_v2  ;;  %v1179_v4 = vld [vmem:[%s2584_s8 + $0x3] sm:$0xff]  ;;  %v1180_v5 = vld [vmem:[%s2584_s8 + $0xb] sm:$0xff]  ;;  %v1127_v7 = vpack.c.bf16 %v1126_v3, %v1125_v1  ;;  %s2032_s19 = sshll.u32 %s476_s21, 3 }
  0x26   : > { %2171 = vmatprep.subr.bf16.mxu0 %v2373_v2  ;;  %2167 = vmatprep.mubr.msk.bf16.mxu1 %vm2374_vm1, %v2373_v2  ;;  %v1181_v9 = vpack.c.bf16 %v1180_v5, %v1179_v4  ;;  %v1233_v12 = vld [vmem:[%s2584_s8 + $0x4] sm:$0xff]  ;;  %v1234_v13 = vld [vmem:[%s2584_s8 + $0xc] sm:$0xff]  ;;  %s478_s24 = scalar_lea.vmem %s2773_s7, %s2032_s19 }
  0x27   : > { %2177 = vmatprep.subr.bf16.mxu1 %v2373_v2  ;;  %v1287_v14 = vld [vmem:[%s2631_s22] sm:$0xff]  ;;  %v1288_v15 = vld [vmem:[%s2631_s22 + $0x8] sm:$0xff]  ;;  %v1235_v17 = vpack.c.bf16 %v1234_v13, %v1233_v12  ;;  %v2080_v56 = vld [vmem:[%s2771_s5 + $0x30] sm:$0x3] }
  0x28   : > { %v1289_v19 = vpack.c.bf16 %v1288_v15, %v1287_v14  ;;  %v1341_v22 = vld [vmem:[%s2631_s22 + $0x1] sm:$0xff]  ;;  %v1342_v23 = vld [vmem:[%s2631_s22 + $0x9] sm:$0xff]  ;;  %v1782_v59 = vsel %vm493_vm0, %v2080_v56, 0 }
  0x29   : > { %v1395_v24 = vld [vmem:[%s2631_s22 + $0x2] sm:$0xff]  ;;  %v1396_v25 = vld [vmem:[%s2631_s22 + $0xa] sm:$0xff]  ;;  %v1343_v27 = vpack.c.bf16 %v1342_v23, %v1341_v22 }
  0x2a   : > { %v2068_v26 = vld [vmem:[%s2771_s5 + $0x24] sm:$0x3]  ;;  %v2070_v28 = vld [vmem:[%s2771_s5 + $0x26] sm:$0x3]  ;;  %v1397_v29 = vpack.c.bf16 %v1396_v25, %v1395_v24  ;;  %v1504_v35 = vld [vmem:[%s2631_s22 + $0xc] sm:$0xff] }
  0x2b   : > { %2162 = vmatmul.mubr.msk.bf16.vlgmr.msra.gmra.mrb[8].mxu0 %vm489_vm2, %v695_v30  ;;  %v1458_v30 = vsel %vm493_vm0, %v2068_v26, 0  ;;  %v1512_v31 = vsel %vm493_vm0, %v2070_v28, 0  ;;  %v2072_v36 = vld [vmem:[%s2771_s5 + $0x28] sm:$0x3]  ;;  %v2074_v38 = vld [vmem:[%s2771_s5 + $0x2a] sm:$0x3] }
  0x2c   : > { %2172 = vmatpush3.bf16.msra.mxu0 %v810_v33  ;;  %2168 = vmatmul.mubr.msk.bf16.vlgmr.msra.gmra.mrb[8].mxu1 %vm489_vm2, %v749_v32  ;;  %v1449_v32 = vld [vmem:[%s2631_s22 + $0x3] sm:$0xff]  ;;  %v1450_v33 = vld [vmem:[%s2631_s22 + $0xb] sm:$0xff]  ;;  %v1620_v41 = vsel %vm493_vm0, %v2074_v38, 0 }
  0x2d   : > { %2178 = vmatpush3.bf16.msra.mxu1 %v864_v34  ;;  %2173 = vmatprep.mubr.msk.bf16.mxu0 %vm2374_vm1, %v2373_v2  ;;  %v1503_v34 = vld [vmem:[%s2631_s22 + $0x4] sm:$0xff]  ;;  %v1451_v37 = vpack.c.bf16 %v1450_v33, %v1449_v32  ;;  %v2076_v46 = vld [vmem:[%s2771_s5 + $0x2c] sm:$0x3]  ;;  %v2078_v48 = vld [vmem:[%s2771_s5 + $0x2e] sm:$0x3] }
  0x2e   : > { %2183 = vmatprep.subr.bf16.mxu0 %v2373_v2  ;;  %2179 = vmatprep.mubr.msk.bf16.mxu1 %vm2374_vm1, %v2373_v2  ;;  %v1505_v39 = vpack.c.bf16 %v1504_v35, %v1503_v34  ;;  %v1612_v45 = vld [vmem:[%s2697_s11 + $0x9] sm:$0xff]  ;;  %v1728_v51 = vsel %vm493_vm0, %v2078_v48, 0 }
  0x2f   : > { %2189 = vmatprep.subr.bf16.mxu1 %v2373_v2  ;;  %v1720_v55 = vld [vmem:[%s2697_s11 + $0xb] sm:$0xff] }
  0x30   : > { %v1774_v61 = vld [vmem:[%s2697_s11 + $0xc] sm:$0xff] }
  0x33   : > { %2174 = vmatmul.mubr.msk.bf16.vlgmr.msra.gmra.mrb[12].mxu0 %vm489_vm2, %v803_v40  ;;  %v1566_v40 = vsel %vm493_vm0, %v2072_v36, 0 }
  0x34   : > { %2184 = vmatpush3.bf16.msra.mxu0 %v918_v43  ;;  %2180 = vmatmul.mubr.msk.bf16.vlgmr.msra.gmra.mrb[12].mxu1 %vm489_vm2, %v857_v42  ;;  %v1557_v42 = vld [vmem:[%s2697_s11] sm:$0xff]  ;;  %v1558_v43 = vld [vmem:[%s2697_s11 + $0x8] sm:$0xff] }
  0x35   : > { %2190 = vmatpush3.bf16.msra.mxu1 %v972_v44  ;;  %2185 = vmatprep.mubr.msk.bf16.mxu0 %vm2374_vm1, %v2373_v2  ;;  %v1611_v44 = vld [vmem:[%s2697_s11 + $0x1] sm:$0xff]  ;;  %v1559_v47 = vpack.c.bf16 %v1558_v43, %v1557_v42 }
  0x36   : > { %2195 = vmatprep.subr.bf16.mxu0 %v2373_v2  ;;  %2191 = vmatprep.mubr.msk.bf16.mxu1 %vm2374_vm1, %v2373_v2  ;;  %v1613_v49 = vpack.c.bf16 %v1612_v45, %v1611_v44 }
  0x37   : > { %2201 = vmatprep.subr.bf16.mxu1 %v2373_v2 }
  0x3b   : > { %2186 = vmatmul.mubr.msk.bf16.vlgmr.msra.gmra.mrb[16].mxu0 %vm489_vm2, %v911_v50  ;;  %v1674_v50 = vsel %vm493_vm0, %v2076_v46, 0 }
  0x3c   : > { %2196 = vmatpush3.bf16.msra.mxu0 %v1026_v53  ;;  %2192 = vmatmul.mubr.msk.bf16.vlgmr.msra.gmra.mrb[16].mxu1 %vm489_vm2, %v965_v52  ;;  %v1665_v52 = vld [vmem:[%s2697_s11 + $0x2] sm:$0xff]  ;;  %v1666_v53 = vld [vmem:[%s2697_s11 + $0xa] sm:$0xff] }
  0x3d   : > { %2202 = vmatpush3.bf16.msra.mxu1 %v1080_v54  ;;  %2197 = vmatprep.mubr.msk.bf16.mxu0 %vm2374_vm1, %v2373_v2  ;;  %v1719_v54 = vld [vmem:[%s2697_s11 + $0x3] sm:$0xff]  ;;  %v1667_v57 = vpack.c.bf16 %v1666_v53, %v1665_v52 }
  0x3e   : > { %2207 = vmatprep.subr.bf16.mxu0 %v2373_v2  ;;  %2203 = vmatprep.mubr.msk.bf16.mxu1 %vm2374_vm1, %v2373_v2  ;;  %v1721_v58 = vpack.c.bf16 %v1720_v55, %v1719_v54 }
  0x3f   : > { %2213 = vmatprep.subr.bf16.mxu1 %v2373_v2 }
  0x43   : > { %2198 = vmatmul.mubr.msk.bf16.vlgmr.msra.gmra.mrb[20].mxu0 %vm489_vm2, %v1019_v60  ;;  %v1773_v60 = vld [vmem:[%s2697_s11 + $0x4] sm:$0xff] }
  0x44   : > { %2208 = vmatpush3.bf16.msra.mxu0 %v1134_v63  ;;  %2204 = vmatmul.mubr.msk.bf16.vlgmr.msra.gmra.mrb[20].mxu1 %vm489_vm2, %v1073_v62  ;;  %v1775_v62 = vpack.c.bf16 %v1774_v61, %v1773_v60 }
  0x45   : > { %2214 = vmatpush3.bf16.msra.mxu1 %v1188_v0  ;;  %2209 = vmatprep.mubr.msk.bf16.mxu0 %vm2374_vm1, %v2373_v2 }
  0x46   : > { %2219 = vmatprep.subr.bf16.mxu0 %v2373_v2  ;;  %2215 = vmatprep.mubr.msk.bf16.mxu1 %vm2374_vm1, %v2373_v2 }
  0x47   : > { %2225 = vmatprep.subr.bf16.mxu1 %v2373_v2 }
  0x4b   : > { %2210 = vmatmul.mubr.msk.bf16.vlgmr.msra.gmra.mrb[24].mxu0 %vm489_vm2, %v1127_v7 }
  0x4c   : > { %2220 = vmatpush3.bf16.msra.mxu0 %v1242_v10  ;;  %2216 = vmatmul.mubr.msk.bf16.vlgmr.msra.gmra.mrb[24].mxu1 %vm489_vm2, %v1181_v9 }
  0x4d   : > { %2226 = vmatpush3.bf16.msra.mxu1 %v1296_v11  ;;  %2221 = vmatprep.mubr.msk.bf16.mxu0 %vm2374_vm1, %v2373_v2 }
  0x4e   : > { %2231 = vmatprep.subr.bf16.mxu0 %v2373_v2  ;;  %2227 = vmatprep.mubr.msk.bf16.mxu1 %vm2374_vm1, %v2373_v2 }
  0x4f   : > { %2237 = vmatprep.subr.bf16.mxu1 %v2373_v2 }
  0x53   : > { %2222 = vmatmul.mubr.msk.bf16.vlgmr.msra.gmra.mrb[28].mxu0 %vm489_vm2, %v1235_v17 }
  0x54   : > { %2232 = vmatpush3.bf16.msra.mxu0 %v1350_v20  ;;  %2228 = vmatmul.mubr.msk.bf16.vlgmr.msra.gmra.mrb[28].mxu1 %vm489_vm2, %v1289_v19 }
  0x55   : > { %2238 = vmatpush3.bf16.msra.mxu1 %v1404_v21  ;;  %2233 = vmatprep.mubr.msk.bf16.mxu0 %vm2374_vm1, %v2373_v2 }
  0x56   : > { %2243 = vmatprep.subr.bf16.mxu0 %v2373_v2  ;;  %2239 = vmatprep.mubr.msk.bf16.mxu1 %vm2374_vm1, %v2373_v2 }
  0x57   : > { %2249 = vmatprep.subr.bf16.mxu1 %v2373_v2 }
  0x5b   : > { %2234 = vmatmul.mubr.msk.bf16.vlgmr.msra.gmra.mrb[32].mxu0 %vm489_vm2, %v1343_v27 }
  0x5c   : > { %2244 = vmatpush3.bf16.msra.mxu0 %v1458_v30  ;;  %2240 = vmatmul.mubr.msk.bf16.vlgmr.msra.gmra.mrb[32].mxu1 %vm489_vm2, %v1397_v29 }
  0x5d   : > { %2250 = vmatpush3.bf16.msra.mxu1 %v1512_v31  ;;  %2245 = vmatprep.mubr.msk.bf16.mxu0 %vm2374_vm1, %v2373_v2 }
  0x5e   : > { %2255 = vmatprep.subr.bf16.mxu0 %v2373_v2  ;;  %2251 = vmatprep.mubr.msk.bf16.mxu1 %vm2374_vm1, %v2373_v2 }
  0x5f   : > { %2261 = vmatprep.subr.bf16.mxu1 %v2373_v2 }
  0x63   : > { %2246 = vmatmul.mubr.msk.bf16.vlgmr.msra.gmra.mrb[36].mxu0 %vm489_vm2, %v1451_v37 }
  0x64   : > { %2256 = vmatpush3.bf16.msra.mxu0 %v1566_v40  ;;  %2252 = vmatmul.mubr.msk.bf16.vlgmr.msra.gmra.mrb[36].mxu1 %vm489_vm2, %v1505_v39 }
  0x65   : > { %2262 = vmatpush3.bf16.msra.mxu1 %v1620_v41  ;;  %2257 = vmatprep.mubr.msk.bf16.mxu0 %vm2374_vm1, %v2373_v2 }
  0x66   : > { %2267 = vmatprep.subr.bf16.mxu0 %v2373_v2  ;;  %2263 = vmatprep.mubr.msk.bf16.mxu1 %vm2374_vm1, %v2373_v2 }
  0x67   : > { %2273 = vmatprep.subr.bf16.mxu1 %v2373_v2 }
  0x6b   : > { %2258 = vmatmul.mubr.msk.bf16.vlgmr.msra.gmra.mrb[40].mxu0 %vm489_vm2, %v1559_v47 }
  0x6c   : > { %2268 = vmatpush3.bf16.msra.mxu0 %v1674_v50  ;;  %2264 = vmatmul.mubr.msk.bf16.vlgmr.msra.gmra.mrb[40].mxu1 %vm489_vm2, %v1613_v49 }
  0x6d   : > { %2274 = vmatpush3.bf16.msra.mxu1 %v1728_v51  ;;  %2269 = vmatprep.mubr.msk.bf16.mxu0 %vm2374_vm1, %v2373_v2 }
  0x6e   : > { %2279 = vmatprep.subr.bf16.mxu0 %v2373_v2  ;;  %2275 = vmatprep.mubr.msk.bf16.mxu1 %vm2374_vm1, %v2373_v2 }
  0x73   : > { %2270 = vmatmul.mubr.msk.bf16.vlgmr.msra.gmra.mrb[44].mxu0 %vm489_vm2, %v1667_v57 }
  0x74   : > { %2280 = vmatpush3.bf16.msra.mxu0 %v1782_v59  ;;  %2276 = vmatmul.mubr.msk.bf16.vlgmr.msra.gmra.mrb[44].mxu1 %vm489_vm2, %v1721_v58 }
  0x75   : > { %2281 = vmatprep.mubr.msk.bf16.mxu0 %vm2374_vm1, %v2373_v2 }
  0x7b   : > { %2282 = vmatmul.mubr.msk.bf16.vlgmr.msra.gmra.mrb[48].mxu0 %vm489_vm2, %v1775_v62 }
  0xee   : > { %v531_v63 = vpop.f32.mrb[0].mxu0 }
  0xef   : > { %v578_v0 = vpop.f32.mrb[0].mxu1  ;;  %v2139_v1 = vpop.f32.mrb[1].mxu0 }
  0xf0   : > { %v579_v3 = vadd.f32 %v578_v0, %v531_v63  ;;  %v2145_v4 = vpop.f32.mrb[1].mxu1  ;;  %v534_v5 = vpop.f32.mrb[2].mxu0 }
  0xf1   : > { %v581_v6 = vpop.f32.mrb[2].mxu1  ;;  %v2140_v7 = vpop.f32.mrb[3].mxu0 }
  0xf2   : > { %v582_v8 = vadd.f32 %v581_v6, %v534_v5  ;;  %v2146_v9 = vpop.f32.mrb[3].mxu1 }
  0xf6   : > { %v630_v10 = vpop.f32.mrb[4].mxu0 }
  0xf7   : > { %v637_v11 = vadd.f32 %v630_v10, %v579_v3  ;;  %v2151_v12 = vpop.f32.mrb[5].mxu0  ;;  %v684_v13 = vpop.f32.mrb[4].mxu1 }
  0xf8   : > { %v633_v14 = vpop.f32.mrb[6].mxu0  ;;  %v2157_v15 = vpop.f32.mrb[5].mxu1 }
  0xf9   : > { %v638_v2 = vadd.f32 %v633_v14, %v582_v8  ;;  %v691_v16 = vadd.f32 %v684_v13, %v637_v11  ;;  %v2152_v17 = vpop.f32.mrb[7].mxu0  ;;  %v687_v18 = vpop.f32.mrb[6].mxu1 }
  0xfa   : > { %v2158_v19 = vpop.f32.mrb[7].mxu1 }
  0xfb   : > { %v692_v20 = vadd.f32 %v687_v18, %v638_v2 }
  0xfe   : > { %v738_v21 = vpop.f32.mrb[8].mxu0 }
  0xff   : > { %v745_v22 = vadd.f32 %v738_v21, %v691_v16  ;;  %v2163_v23 = vpop.f32.mrb[9].mxu0  ;;  %v792_v24 = vpop.f32.mrb[8].mxu1 }
 0x100   : > { %v741_v25 = vpop.f32.mrb[10].mxu0  ;;  %v2169_v26 = vpop.f32.mrb[9].mxu1 }
 0x101   : > { %v746_v27 = vadd.f32 %v741_v25, %v692_v20  ;;  %v799_v28 = vadd.f32 %v792_v24, %v745_v22  ;;  %v2164_v29 = vpop.f32.mrb[11].mxu0  ;;  %v795_v30 = vpop.f32.mrb[10].mxu1 }
 0x102   : > { %v2170_v31 = vpop.f32.mrb[11].mxu1 }
 0x103   : > { %v800_v32 = vadd.f32 %v795_v30, %v746_v27 }
 0x106   : > { %v846_v33 = vpop.f32.mrb[12].mxu0 }
 0x107   : > { %v853_v34 = vadd.f32 %v846_v33, %v799_v28  ;;  %v2175_v35 = vpop.f32.mrb[13].mxu0  ;;  %v900_v36 = vpop.f32.mrb[12].mxu1 }
 0x108   : > { %v849_v37 = vpop.f32.mrb[14].mxu0  ;;  %v2181_v38 = vpop.f32.mrb[13].mxu1 }
 0x109   : > { %v854_v39 = vadd.f32 %v849_v37, %v800_v32  ;;  %v907_v40 = vadd.f32 %v900_v36, %v853_v34  ;;  %v2176_v41 = vpop.f32.mrb[15].mxu0  ;;  %v903_v42 = vpop.f32.mrb[14].mxu1 }
 0x10a   : > { %v2182_v43 = vpop.f32.mrb[15].mxu1 }
 0x10b   : > { %v908_v44 = vadd.f32 %v903_v42, %v854_v39 }
 0x10e   : > { %v954_v45 = vpop.f32.mrb[16].mxu0 }
 0x10f   : > { %v961_v46 = vadd.f32 %v954_v45, %v907_v40  ;;  %v2187_v47 = vpop.f32.mrb[17].mxu0  ;;  %v1008_v48 = vpop.f32.mrb[16].mxu1 }
 0x110   : > { %v957_v49 = vpop.f32.mrb[18].mxu0  ;;  %v2193_v50 = vpop.f32.mrb[17].mxu1 }
 0x111   : > { %v962_v51 = vadd.f32 %v957_v49, %v908_v44  ;;  %v1015_v52 = vadd.f32 %v1008_v48, %v961_v46  ;;  %v2188_v53 = vpop.f32.mrb[19].mxu0  ;;  %v1011_v54 = vpop.f32.mrb[18].mxu1 }
 0x112   : > { %v2194_v55 = vpop.f32.mrb[19].mxu1 }
 0x113   : > { %v1016_v56 = vadd.f32 %v1011_v54, %v962_v51 }
 0x116   : > { %v1062_v57 = vpop.f32.mrb[20].mxu0 }
 0x117   : > { %v1069_v58 = vadd.f32 %v1062_v57, %v1015_v52  ;;  %v2199_v59 = vpop.f32.mrb[21].mxu0  ;;  %v1116_v60 = vpop.f32.mrb[20].mxu1 }
 0x118   : > { %v1065_v61 = vpop.f32.mrb[22].mxu0  ;;  %v2205_v62 = vpop.f32.mrb[21].mxu1 }
 0x119   : > { %v1070_v63 = vadd.f32 %v1065_v61, %v1016_v56  ;;  %v1123_v0 = vadd.f32 %v1116_v60, %v1069_v58  ;;  %v2200_v1 = vpop.f32.mrb[23].mxu0  ;;  %v1119_v3 = vpop.f32.mrb[22].mxu1 }
 0x11a   : > { %v2206_v4 = vpop.f32.mrb[23].mxu1 }
 0x11b   : > { %v1124_v5 = vadd.f32 %v1119_v3, %v1070_v63 }
 0x11e   : > { %v1170_v6 = vpop.f32.mrb[24].mxu0 }
 0x11f   : > { %v1177_v7 = vadd.f32 %v1170_v6, %v1123_v0  ;;  %v2211_v8 = vpop.f32.mrb[25].mxu0  ;;  %v1224_v9 = vpop.f32.mrb[24].mxu1 }
 0x120   : > { %v1173_v10 = vpop.f32.mrb[26].mxu0  ;;  %v2217_v11 = vpop.f32.mrb[25].mxu1 }
 0x121   : > { %v1178_v12 = vadd.f32 %v1173_v10, %v1124_v5  ;;  %v1231_v13 = vadd.f32 %v1224_v9, %v1177_v7  ;;  %v2212_v14 = vpop.f32.mrb[27].mxu0  ;;  %v1227_v15 = vpop.f32.mrb[26].mxu1 }
 0x122   : > { %v2218_v2 = vpop.f32.mrb[27].mxu1 }
 0x123   : > { %v1232_v16 = vadd.f32 %v1227_v15, %v1178_v12  ;;  %v2082_v15 = vld [vmem:[%s2772_s6] ss:$0 sm:$0xff] }
 0x126   : > { %v1278_v17 = vpop.f32.mrb[28].mxu0 }
 0x127   : > { %v1285_v18 = vadd.f32 %v1278_v17, %v1231_v13  ;;  %v2223_v19 = vpop.f32.mrb[29].mxu0  ;;  %v1332_v20 = vpop.f32.mrb[28].mxu1 }
 0x128   : > { %v1281_v21 = vpop.f32.mrb[30].mxu0  ;;  %v2229_v22 = vpop.f32.mrb[29].mxu1 }
 0x129   : > { %v1286_v23 = vadd.f32 %v1281_v21, %v1232_v16  ;;  %v1339_v24 = vadd.f32 %v1332_v20, %v1285_v18  ;;  %v2224_v25 = vpop.f32.mrb[31].mxu0  ;;  %v1335_v26 = vpop.f32.mrb[30].mxu1 }
 0x12a   : > { %v2230_v27 = vpop.f32.mrb[31].mxu1 }
 0x12b   : > { %v1340_v28 = vadd.f32 %v1335_v26, %v1286_v23 }
 0x12e   : > { %v1386_v29 = vpop.f32.mrb[32].mxu0 }
 0x12f   : > { %v1393_v30 = vadd.f32 %v1386_v29, %v1339_v24  ;;  %v2235_v31 = vpop.f32.mrb[33].mxu0  ;;  %v1440_v32 = vpop.f32.mrb[32].mxu1 }
 0x130   : > { %v1389_v33 = vpop.f32.mrb[34].mxu0  ;;  %v2241_v34 = vpop.f32.mrb[33].mxu1 }
 0x131   : > { %v1394_v35 = vadd.f32 %v1389_v33, %v1340_v28  ;;  %v1447_v36 = vadd.f32 %v1440_v32, %v1393_v30  ;;  %v2236_v37 = vpop.f32.mrb[35].mxu0  ;;  %v1443_v38 = vpop.f32.mrb[34].mxu1 }
 0x132   : > { %v2242_v39 = vpop.f32.mrb[35].mxu1 }
 0x133   : > { %v1448_v40 = vadd.f32 %v1443_v38, %v1394_v35 }
 0x136   : > { %v1494_v41 = vpop.f32.mrb[36].mxu0 }
 0x137   : > { %v1501_v42 = vadd.f32 %v1494_v41, %v1447_v36  ;;  %v2247_v43 = vpop.f32.mrb[37].mxu0  ;;  %v1548_v44 = vpop.f32.mrb[36].mxu1 }
 0x138   : > { %v1497_v45 = vpop.f32.mrb[38].mxu0  ;;  %v2253_v46 = vpop.f32.mrb[37].mxu1 }
 0x139   : > { %v1502_v47 = vadd.f32 %v1497_v45, %v1448_v40  ;;  %v1555_v48 = vadd.f32 %v1548_v44, %v1501_v42  ;;  %v2248_v49 = vpop.f32.mrb[39].mxu0  ;;  %v1551_v50 = vpop.f32.mrb[38].mxu1 }
 0x13a   : > { %v2254_v51 = vpop.f32.mrb[39].mxu1 }
 0x13b   : > { %v1556_v52 = vadd.f32 %v1551_v50, %v1502_v47 }
 0x13e   : > { %v1602_v53 = vpop.f32.mrb[40].mxu0 }
 0x13f   : > { %v1609_v54 = vadd.f32 %v1602_v53, %v1555_v48  ;;  %v2259_v55 = vpop.f32.mrb[41].mxu0  ;;  %v1656_v56 = vpop.f32.mrb[40].mxu1 }
 0x140   : > { %v1605_v57 = vpop.f32.mrb[42].mxu0  ;;  %v2265_v58 = vpop.f32.mrb[41].mxu1 }
 0x141   : > { %v1610_v59 = vadd.f32 %v1605_v57, %v1556_v52  ;;  %v1663_v60 = vadd.f32 %v1656_v56, %v1609_v54  ;;  %v2260_v61 = vpop.f32.mrb[43].mxu0  ;;  %v1659_v62 = vpop.f32.mrb[42].mxu1 }
 0x142   : > { %v2266_v63 = vpop.f32.mrb[43].mxu1 }
 0x143   : > { %v1664_v0 = vadd.f32 %v1659_v62, %v1610_v59 }
 0x146   : > { %v1710_v1 = vpop.f32.mrb[44].mxu0 }
 0x147   : > { %v1717_v3 = vadd.f32 %v1710_v1, %v1663_v60  ;;  %v2271_v4 = vpop.f32.mrb[45].mxu0  ;;  %v1764_v5 = vpop.f32.mrb[44].mxu1 }
 0x148   : > { %v1713_v6 = vpop.f32.mrb[46].mxu0  ;;  %v2277_v7 = vpop.f32.mrb[45].mxu1 }
 0x149   : > { %v1718_v8 = vadd.f32 %v1713_v6, %v1664_v0  ;;  %v1771_v9 = vadd.f32 %v1764_v5, %v1717_v3  ;;  %v2272_v10 = vpop.f32.mrb[47].mxu0  ;;  %v1767_v11 = vpop.f32.mrb[46].mxu1 }
 0x14a   : > { %v2278_v12 = vpop.f32.mrb[47].mxu1 }
 0x14b   : > { %v1772_v13 = vadd.f32 %v1767_v11, %v1718_v8 }
 0x14e   : > { %v1818_v14 = vpop.f32.mrb[48].mxu0 }
 0x14f   : > { %v1825_v2 = vadd.f32 %v1818_v14, %v1771_v9  ;;  %v2283_v16 = vpop.f32.mrb[49].mxu0 }
 0x150   : > { %v1821_v17 = vpop.f32.mrb[50].mxu0 }
 0x151   : > { %v1834_v18 = vadd.f32 %v2082_v15, %v1825_v2  ;;  %v1826_v19 = vadd.f32 %v1821_v17, %v1772_v13  ;;  %v2284_v20 = vpop.f32.mrb[51].mxu0 }
 0x153   : > { %v1836_v21 = vmax.f32 %v1834_v18, 0.0  ;;  %v1835_v22 = vadd.f32 %v2082_v15, %v1826_v19 }
 0x155   : > { %1839 = vst.msk [vmem:[%s478_s24] sm:$0xff] %vm1838_vm3, %v1836_v21  ;;  %v1837_v23 = vmax.f32 %v1835_v22, 0.0 }
 0x157   : > { %1840 = vst.msk [vmem:[%s478_s24 + $0x8] sm:$0xff] %vm1838_vm3, %v1837_v23 }
 0x158 PF: > { %s17_s28 = sadd.s32 1, %s2371_s28   ;;  %s2774_s24 = smov %s2363_s26 }
 0x159   : > { %p14_p12 = scmp.ge.s32.totalorder %s17_s28, 34   ;;  %s2775_s25 = smov %s2367_s27 }
 0x15a   : > { %s2776_s26 = smov %s2779_s29  ;;  %s2777_s27 = smov %s2783_s30 }
 0x15b   :  { %16 = sbr.rel (!%p14_p12) target bundleno = 3 (0x3), region = 114 }

</bundles_post_ra>
